<compile_context>
chip_gen: v6e
topology: v6e:2x2x1
jax: 0.10.0
libtpu: 0.0.40
codegen_flags: <defaults>
</compile_context>

<pallas_src>
import math
import functools

import numpy as np
import jax
import jax.numpy as jnp
from jax import lax
from jax.experimental import pallas as pl
from jax.experimental.pallas import tpu as pltpu

DYNAMIC_THRESHOLDING_MIMIC_SCALE = 7.5
DYNAMIC_THRESHOLDING_PERCENTILE = 0.9995


# ----------------------------------------------------------------------------
# Per-channel reduction helpers over the last two (sublane, lane) axes.
# ----------------------------------------------------------------------------
def _max_last2(x):
    return jnp.max(jnp.max(x, axis=2, keepdims=True), axis=1, keepdims=True)


def _sum_last2(x):
    return jnp.sum(jnp.sum(x, axis=2, keepdims=True), axis=1, keepdims=True)


def _mean_last2(x):
    inv = 1.0 / float(x.shape[1] * x.shape[2])
    return _sum_last2(x) * inv


def _quantile_abs_last2(x, q, *, unroll_limit=8):
    """Per-channel linear-interpolated quantile over the last two axes.

    x: (C, R, L) of NON-NEGATIVE float32 values -> (C, 1, 1).
    Matches torch.quantile(..., interpolation='linear') on the flattened
    (R*L) axis.  Tie-safe iterative max extraction; for high percentiles the
    pass count m = n - floor(q*(n-1)) is small (2 for n=256, ~0.0005*n
    asymptotically).  Small m is statically unrolled, large m uses a
    fori_loop to bound code size / vreg live ranges.
    """
    C, R, L = x.shape
    n = R * L
    pos = q * (n - 1)
    k = int(math.floor(pos))
    frac = jnp.float32(pos - k)
    if k >= n - 1:
        return _max_last2(x)

    p_k = float(n - 1 - k)     # from-top rank of the k-th smallest value
    p_k1 = float(n - 2 - k)    # from-top rank of the (k+1)-th smallest value
    m = n - k                  # worst-case (tie-free) number of passes

    def step(carry):
        xm, removed, v_k, v_k1, got_k, got_k1 = carry
        cur = _max_last2(xm)
        eq = (xm == cur).astype(jnp.float32)
        cnt = _sum_last2(eq)
        upper = removed + cnt
        in_k = jnp.logical_and(removed <= p_k, p_k < upper)
        in_k1 = jnp.logical_and(removed <= p_k1, p_k1 < upper)
        hit_k = jnp.logical_and(got_k < 0.5, in_k)
        hit_k1 = jnp.logical_and(got_k1 < 0.5, in_k1)
        v_k = jnp.where(hit_k, cur, v_k)
        v_k1 = jnp.where(hit_k1, cur, v_k1)
        got_k = jnp.maximum(got_k, hit_k.astype(jnp.float32))
        got_k1 = jnp.maximum(got_k1, hit_k1.astype(jnp.float32))
        # Values are absolute (>= 0): a zero fill can never resurface as an
        # incorrect new maximum, and is cheaper than an -inf fill.
        xm = xm * (1.0 - eq)
        removed = upper
        return (xm, removed, v_k, v_k1, got_k, got_k1)

    zeros = jnp.zeros((C, 1, 1), jnp.float32)
    carry = (x, zeros, zeros, zeros, zeros, zeros)
    if m <= unroll_limit:
        for _ in range(m):
            carry = step(carry)
    else:
        # TODO(synk): for very large HW (>= 64K) a count-threshold bisection
        # (~2*log2 passes) would beat this O(m) extraction loop.
        carry = lax.fori_loop(0, m, lambda _, c: step(c), carry)
    _, _, v_k, v_k1, _, _ = carry
    return v_k + frac * (v_k1 - v_k)


# ----------------------------------------------------------------------------
# Pallas kernel: CFG combine + dynamic thresholding + group sum + mask blend
# ----------------------------------------------------------------------------
def _cfg_dynthresh_kernel(cidx_ref, w_ref, wm_ref, valid_ref,   # SMEM prefetch
                          *refs,
                          num_slots, S, P,
                          use_dynamic_thresholding, apply_mask, all_valid,
                          quantile_unroll_limit):
    pos = 0
    cond_refs = refs[pos:pos + num_slots]
    pos += num_slots
    uncond_ref = refs[pos]
    pos += 1
    if apply_mask:
        xfro_ref = refs[pos]
        mask_ref = refs[pos + 1]
        pos += 2
    out_ref = refs[pos]

    s = pl.program_id(0)          # sample           (parallel)
    p = pl.program_id(2)          # cond-slot step   (arbitrary, innermost)

    # uncond block is resident in VMEM for the whole (sample, channel-group)
    # tile; one upcast per grid step is cheap relative to the cond sweeps.
    # TODO(synk): for P > 1 with sub-f32 inputs, an f32 VMEM uncond cache
    # filled at p == 0 would save the per-step re-cast.
    uncond = uncond_ref[...].astype(jnp.float32)      # (Cg, R, L)

    def slot_contribution(j):
        idx = (j * S + s) * P + p                     # flat SMEM index
        w = w_ref[idx]                                # cond_weight * cond_scale
        delta = cond_refs[j][...].astype(jnp.float32) - uncond
        if use_dynamic_thresholding:
            wm = wm_ref[idx]                          # mimic weight
            mean_d = _mean_last2(delta)
            dc = delta - mean_d
            # One per-channel quantile of |centered delta|; target and mimic
            # quantiles are exact scalar multiples of it, and scale_factor
            # cancels algebraically, so neither enters the kernel.
            # (dt_q == 0 NaNs here exactly like the reference quantile path.)
            q = _quantile_abs_last2(jnp.abs(dc),
                                    DYNAMIC_THRESHOLDING_PERCENTILE,
                                    unroll_limit=quantile_unroll_limit)
            dt_q = jnp.abs(wm) * q
            ut_q = jnp.maximum(jnp.abs(w) * q, dt_q)
            inv_ratio = dt_q / ut_q                   # (Cg, 1, 1) only
            return (dc * inv_ratio + mean_d) * w
        return delta * w

    # Dense case (all slots valid) or thresholding off (zero weight already
    # nulls invalid slots): no pl.when guards, register-sum of all slots and
    # ONE accumulator read-modify-write per grid step.
    guarded = use_dynamic_thresholding and not all_valid

    if not guarded:
        total = slot_contribution(0)
        for j in range(1, num_slots):
            total = total + slot_contribution(j)
        if P == 1:
            out_ref[...] = uncond + total
        else:
            @pl.when(p == 0)
            def _():
                out_ref[...] = uncond
            out_ref[...] = out_ref[...] + total
    else:
        # Ragged-arity dynamic thresholding: a zero weight would propagate
        # NaN through the quantile rescale, so invalid slots must be skipped.
        if P == 1:
            out_ref[...] = uncond
        else:
            @pl.when(p == 0)
            def _():
                out_ref[...] = uncond
        for j in range(num_slots):
            idx = (j * S + s) * P + p

            @pl.when(valid_ref[idx] > 0)
            def _(j=j):
                out_ref[...] = out_ref[...] + slot_contribution(j)

    if apply_mask:
        # Blend only once, on the sample's final step (the only store whose
        # value is flushed to HBM).
        def _blend():
            m = mask_ref[...].astype(jnp.float32)     # (1 or Cg, R, L)
            out_ref[...] = (xfro_ref[...].astype(jnp.float32) * m
                            + out_ref[...] * (1.0 - m))
        if P == 1:
            _blend()
        else:
            pl.when(p == P - 1)(_blend)


def cfg_combine_pallas(uncond_out, conds_out, cond_arities, weights,
                       weights_mimic, x_frozen=None, mask=None,
                       use_dynamic_thresholding=True,
                       conds_per_step=None, channels_per_block=None,
                       quantile_unroll_limit=8, cond_buffering=None):
    S, C, H, W = uncond_out.shape
    N = conds_out.shape[0]
    HW = H * W

    arities = np.asarray(cond_arities, dtype=np.int64)
    assert int(arities.sum()) == N and arities.shape[0] == S
    a_max = int(arities.max()) if S > 0 else 1

    if conds_per_step is None:
        # Non-dynthresh path is pure HBM-bound elementwise work: do the whole
        # sample in one grid step.  With thresholding the quantile loop
        # dominates, so 2 conds/step keeps VMEM pressure and unroll modest.
        conds_per_step = a_max if not use_dynamic_thresholding else 2
    num_slots = max(1, min(int(conds_per_step), max(a_max, 1)))
    P = max(1, -(-a_max // num_slots))                # ceil

    if cond_buffering is None and not use_dynamic_thresholding:
        cond_buffering = 3      # deeper pipelining hides cond DMA latency

    # Lane-dense layout: (.., C, HW/128, 128) -> full lane axis, unmasked vst.
    if HW % 128 == 0:
        L = 128
        R = HW // 128
    else:
        # TODO(synk): pad odd spatial sizes up to a lane multiple of 128
        # instead of falling back to a single (possibly masked) lane row.
        L = HW
        R = 1

    # Channel groups as a second "parallel" grid axis (feeds both v7x TCs even
    # when the sample count is 1-2); dynthresh math is per-channel so exact.
    if channels_per_block is None:
        Cg = C // 2 if (C % 2 == 0 and C >= 2) else C
    else:
        Cg = int(channels_per_block)
    assert C % Cg == 0
    G = C // Cg

    offsets = np.concatenate([[0], np.cumsum(arities)[:-1]]).astype(np.int64)
    w_np = np.asarray(weights, dtype=np.float32)
    wm_np = np.asarray(weights_mimic, dtype=np.float32)

    # Host-built schedule tables (SMEM via scalar prefetch), flattened to 1-D
    # to avoid SMEM 2-D padding blowup.  Invalid slots repeat the previous
    # step's cond index so consecutive equal block indices let Pallas elide
    # the (unused) cond DMA; their weight stays 0.
    cidx = np.zeros((num_slots, S, P), np.int32)
    wtab = np.zeros((num_slots, S, P), np.float32)
    wmtab = np.zeros((num_slots, S, P), np.float32)
    vtab = np.zeros((num_slots, S, P), np.int32)
    last_idx = [0] * num_slots
    for si in range(S):
        for pi in range(P):
            for j in range(num_slots):
                a = pi * num_slots + j
                if a < int(arities[si]):
                    ncond = int(offsets[si] + a)
                    cidx[j, si, pi] = ncond
                    wtab[j, si, pi] = w_np[ncond]
                    wmtab[j, si, pi] = wm_np[ncond]
                    vtab[j, si, pi] = 1
                    last_idx[j] = ncond
                else:
                    cidx[j, si, pi] = last_idx[j]
    all_valid = bool(vtab.all())

    cidx_f = jnp.asarray(cidx.reshape(-1))
    w_f = jnp.asarray(wtab.reshape(-1))
    wm_f = jnp.asarray(wmtab.reshape(-1))
    v_f = jnp.asarray(vtab.reshape(-1))

    # Keep input dtypes (bf16 inputs halve DMA bytes); upcast in-register.
    co = conds_out.reshape(N, C, R, L)
    uo = uncond_out.reshape(S, C, R, L)

    apply_mask = mask is not None
    if apply_mask:
        assert x_frozen is not None
        Cm = mask.shape[1]
        assert Cm in (1, C) and x_frozen.shape[1] == C
        mk = mask.reshape(S, Cm, R, L)
        xf = x_frozen.reshape(S, C, R, L)

    kernel = functools.partial(
        _cfg_dynthresh_kernel,
        num_slots=num_slots, S=S, P=P,
        use_dynamic_thresholding=use_dynamic_thresholding,
        apply_mask=apply_mask, all_valid=all_valid,
        quantile_unroll_limit=quantile_unroll_limit)

    def _cond_map(j):
        def imap(s, g, p, cidx_ref, w_ref, wm_ref, v_ref):
            return (cidx_ref[(j * S + s) * P + p], g, 0, 0)
        return imap

    def _sample_map(s, g, p, *prefetch):
        return (s, g, 0, 0)

    def _mask_map(s, g, p, *prefetch):
        return (s, 0, 0, 0)

    def _make_cond_spec(j, buffering):
        if buffering is not None:
            try:
                return pl.BlockSpec((None, Cg, R, L), _cond_map(j),
                                    pipeline_mode=pl.Buffered(int(buffering)))
            except (TypeError, AttributeError):
                pass
        return pl.BlockSpec((None, Cg, R, L), _cond_map(j))

    def _run(buffering):
        cond_specs = [_make_cond_spec(j, buffering) for j in range(num_slots)]
        in_specs = cond_specs + [pl.BlockSpec((None, Cg, R, L), _sample_map)]
        args = [cidx_f, w_f, wm_f, v_f] + [co] * num_slots + [uo]
        if apply_mask:
            in_specs += [pl.BlockSpec((None, Cg, R, L), _sample_map),
                         pl.BlockSpec((None, 1 if Cm == 1 else Cg, R, L),
                                      _mask_map if Cm == 1 else _sample_map)]
            args += [xf, mk]

        grid_spec = pltpu.PrefetchScalarGridSpec(
            num_scalar_prefetch=4,   # cond index, weight, mimic weight, valid
            grid=(S, G, P),
            in_specs=in_specs,
            out_specs=pl.BlockSpec((None, Cg, R, L), _sample_map),
        )
        # TODO(synk): optionally expose a bf16 out_shape with an f32 VMEM
        # scratch accumulator to halve output writeback on v5e.
        return pl.pallas_call(
            kernel,
            out_shape=jax.ShapeDtypeStruct((S, C, R, L), jnp.float32),
            grid_spec=grid_spec,
            compiler_params=pltpu.CompilerParams(
                dimension_semantics=("parallel", "parallel", "arbitrary")),
        )(*args)

    if cond_buffering is not None:
        try:
            out = _run(cond_buffering)
        except Exception:
            out = _run(None)      # fall back to default double buffering
    else:
        out = _run(None)

    return out.reshape(S, C, H, W)


# ----------------------------------------------------------------------------
# Synthetic inner model (stand-in for the UNet passed to __init__) — JAX glue.
# ----------------------------------------------------------------------------
def synthetic_inner_model(x_in, sigma_in, cond_in, *, w_proj):
    c_skip = 1.0 / (sigma_in ** 2 + 1.0)
    feat = jnp.tanh(jnp.mean(cond_in, axis=1) @ w_proj)      # [Nin, C]
    return (x_in * c_skip[:, None, None, None]
            + 0.1 * feat[:, :, None, None] * sigma_in[:, None, None, None])


# ----------------------------------------------------------------------------
# Module analog
# ----------------------------------------------------------------------------
class KCFGDenoiserMaskedPallas:
    def __init__(self, inner_model, scale_factor):
        self.inner_model = inner_model
        self.scale_factor = float(scale_factor)

    def __call__(self, x, sigma, uncond, cond, cond_scale,
                 cond_arities=None, cond_weights=None,
                 use_dynamic_thresholding=True, use_half=False,
                 mask=None, x_frozen=None,
                 conds_per_step=None, channels_per_block=None):
        # TODO(synk): use_half (fp16 cast of x) and dict-style conditioning
        # (c_crossattn / c_concat branching) are not implemented here.
        S = uncond.shape[0]
        N = cond.shape[0]
        arities = np.asarray(cond_arities, dtype=np.int32)
        assert int(arities.sum()) == N and len(arities) == S

        # cat_self_with_repeat_interleaved
        x_rep = jnp.repeat(x, arities, axis=0, total_repeat_length=N)
        sig_rep = jnp.repeat(sigma, arities, axis=0, total_repeat_length=N)
        x_in = jnp.concatenate([x, x_rep], axis=0)
        sigma_in = jnp.concatenate([sigma, sig_rep], axis=0)
        cond_in = jnp.concatenate([uncond, cond], axis=0)

        out = self.inner_model(x_in, sigma_in, cond_in)
        uncond_out, conds_out = out[:S], out[S:]

        cw = np.asarray(cond_weights, dtype=np.float32)
        weights = cw * float(cond_scale)
        weights_mimic = cw / cw.max() * DYNAMIC_THRESHOLDING_MIMIC_SCALE
        # NOTE: self.scale_factor cancels algebraically inside the dynamic
        # thresholding rescale, so it is not forwarded to the kernel.

        if mask is not None:
            assert x_frozen is not None

        return cfg_combine_pallas(
            uncond_out, conds_out, arities, weights, weights_mimic,
            x_frozen=x_frozen, mask=mask,
            use_dynamic_thresholding=use_dynamic_thresholding,
            conds_per_step=conds_per_step,
            channels_per_block=channels_per_block)


# ----------------------------------------------------------------------------
# Pure-JAX reference (mirrors the PyTorch semantics) for a correctness check
# ----------------------------------------------------------------------------
def reference_forward(x, sigma, uncond, cond, cond_scale, cond_arities,
                      cond_weights, scale_factor, inner_model,
                      use_dynamic_thresholding=True, mask=None, x_frozen=None):
    S = uncond.shape[0]
    N = cond.shape[0]
    arities = np.asarray(cond_arities, dtype=np.int32)
    x_in = jnp.concatenate(
        [x, jnp.repeat(x, arities, axis=0, total_repeat_length=N)], axis=0)
    sigma_in = jnp.concatenate(
        [sigma, jnp.repeat(sigma, arities, axis=0, total_repeat_length=N)], axis=0)
    cond_in = jnp.concatenate([uncond, cond], axis=0)
    out = inner_model(x_in, sigma_in, cond_in)
    uncond_out, conds_out = out[:S], out[S:]
    unconds = jnp.repeat(uncond_out, arities, axis=0, total_repeat_length=N)

    cw = np.asarray(cond_weights, dtype=np.float32)
    wt = (cw * float(cond_scale)).reshape(N, 1, 1, 1)
    deltas = conds_out - unconds
    if use_dynamic_thresholding:
        wtm = (cw / cw.max() * DYNAMIC_THRESHOLDING_MIMIC_SCALE).reshape(N, 1, 1, 1)
        deltas_target = deltas * wt
        deltas_mimic = deltas * wtm
        C = deltas.shape[1]
        dt = (deltas_mimic / scale_factor).reshape(N, C, -1)
        dt_means = dt.mean(axis=2, keepdims=True)
        dt_c = dt - dt_means
        dt_q = jnp.quantile(jnp.abs(dt_c), DYNAMIC_THRESHOLDING_PERCENTILE, axis=2)
        ut = (deltas_target / scale_factor).reshape(N, C, -1)
        ut_means = ut.mean(axis=2, keepdims=True)
        ut_c = ut - ut_means
        ut_q = jnp.quantile(jnp.abs(ut_c), DYNAMIC_THRESHOLDING_PERCENTILE, axis=2)
        ut_q = jnp.maximum(ut_q, dt_q)
        q_ratio = (ut_q / dt_q)[..., None]
        thresh = ((ut_c / q_ratio + ut_means).reshape(deltas.shape)) * scale_factor
    else:
        thresh = deltas * wt

    seg = jnp.asarray(np.repeat(np.arange(S), arities))
    cond_sum = jax.ops.segment_sum(thresh, seg, num_segments=S)
    denoised = uncond_out + cond_sum
    if mask is None:
        return denoised
    return x_frozen * mask + denoised * (1.0 - mask)


# ----------------------------------------------------------------------------
def _run_case(seed, cond_arities, cond_weights, *, use_dynamic_thresholding,
              use_mask, conds_per_step=None, S=2, C=4, H=16, W=16, T=8, E=32,
              cond_scale=7.5, scale_factor=0.18215):
    key = jax.random.PRNGKey(seed)
    k1, k2, k3, k4, k5, k6, k7 = jax.random.split(key, 7)
    N = int(sum(cond_arities))

    x = jax.random.normal(k1, (S, C, H, W), jnp.float32)
    sigma = jnp.abs(jax.random.normal(k2, (S,), jnp.float32)) + 0.5
    uncond = jax.random.normal(k3, (S, T, E), jnp.float32)
    cond = jax.random.normal(k4, (N, T, E), jnp.float32)
    if use_mask:
        mask = (jax.random.uniform(k5, (S, 1, H, W)) > 0.5).astype(jnp.float32)
        x_frozen = jax.random.normal(k6, (S, C, H, W), jnp.float32)
    else:
        mask = None
        x_frozen = None
    w_proj = 0.1 * jax.random.normal(k7, (E, C), jnp.float32)

    inner = functools.partial(synthetic_inner_model, w_proj=w_proj)
    model = KCFGDenoiserMaskedPallas(inner, scale_factor=scale_factor)

    out = model(x, sigma, uncond, cond, cond_scale,
                cond_arities=cond_arities, cond_weights=cond_weights,
                use_dynamic_thresholding=use_dynamic_thresholding,
                mask=mask, x_frozen=x_frozen, conds_per_step=conds_per_step)
    out = jax.block_until_ready(out)

    ref = reference_forward(x, sigma, uncond, cond, cond_scale, cond_arities,
                            cond_weights, scale_factor, inner,
                            use_dynamic_thresholding=use_dynamic_thresholding,
                            mask=mask, x_frozen=x_frozen)
    ref = jax.block_until_ready(ref)

    assert out.shape == (S, C, H, W)
    np.testing.assert_allclose(np.asarray(out), np.asarray(ref),
                               rtol=1e-3, atol=1e-4)


if __name__ == "__main__":
    # 1) ragged arities + dynamic thresholding + mask blend
    #    -> guarded per-slot path, 2 cond slots per grid step.
    _run_case(0, cond_arities=(2, 1), cond_weights=(1.0, 0.6, 1.2),
              use_dynamic_thresholding=True, use_mask=True, conds_per_step=2)
    # 2) uniform arities + dynamic thresholding, no mask
    #    -> dense guard-free path, P=2 steps with resident accumulator.
    _run_case(1, cond_arities=(2, 2), cond_weights=(1.0, 0.6, 1.2, 0.8),
              use_dynamic_thresholding=True, use_mask=False, conds_per_step=1)
    # 3) ragged arities, thresholding off, no mask
    #    -> whole sample in one step (3 slots), zero-weight masking of the
    #       invalid slot, deeper cond buffering, no mask/x_frozen streams.
    _run_case(2, cond_arities=(3, 1), cond_weights=(1.0, 0.6, 1.2, 0.8),
              use_dynamic_thresholding=False, use_mask=False)
    print("KERNEL_OK")
</pallas_src>

<mosaic_0001>
module attributes {stable_mosaic.version = 11 : i64} {
  func.func @_cfg_dynthresh_kernel(%arg0: i32, %arg1: i32, %arg2: i32, %arg3: memref<4xi32, #tpu.memory_space<smem>>, %arg4: memref<4xf32, #tpu.memory_space<smem>>, %arg5: memref<4xf32, #tpu.memory_space<smem>>, %arg6: memref<4xi32, #tpu.memory_space<smem>>, %arg7: memref<1x2x2x128xf32, #tpu.memory_space<vmem>>, %arg8: memref<1x2x2x128xf32, #tpu.memory_space<vmem>>, %arg9: memref<1x2x2x128xf32, #tpu.memory_space<vmem>>, %arg10: memref<1x2x2x128xf32, #tpu.memory_space<vmem>>, %arg11: memref<1x1x2x128xf32, #tpu.memory_space<vmem>>, %arg12: memref<1x2x2x128xf32, #tpu.memory_space<vmem>>) attributes {dimension_semantics = [#tpu.dimension_semantics<parallel>, #tpu.dimension_semantics<parallel>, #tpu.dimension_semantics<arbitrary>], iteration_bounds = array<i64: 2, 2, 1>, scalar_prefetch = 4 : i64, scratch_operands = 0 : i64, tpu.core_type = #tpu.core_type<tc>, window_params = [{transform_indices = @transform_0, window_bounds = array<i64: 1, 2, 2, 128>}, {transform_indices = @transform_1, window_bounds = array<i64: 1, 2, 2, 128>}, {transform_indices = @transform_2, window_bounds = array<i64: 1, 2, 2, 128>}, {transform_indices = @transform_3, window_bounds = array<i64: 1, 2, 2, 128>}, {transform_indices = @transform_4, window_bounds = array<i64: 1, 1, 2, 128>}, {transform_indices = @transform_5, window_bounds = array<i64: 1, 2, 2, 128>}]} {
    %c0 = arith.constant 0 : index
    %c0_0 = arith.constant 0 : index
    %c0_1 = arith.constant 0 : index
    %c0_2 = arith.constant 0 : index
    %0 = vector.load %arg9[%c0, %c0_0, %c0_1, %c0_2] : memref<1x2x2x128xf32, #tpu.memory_space<vmem>>, vector<1x2x2x128xf32>
    %1 = vector.shape_cast %0 : vector<1x2x2x128xf32> to vector<2x2x128xf32>
    %c0_3 = arith.constant 0 : index
    %c0_4 = arith.constant 0 : index
    %c0_5 = arith.constant 0 : index
    %c0_6 = arith.constant 0 : index
    %2 = vector.load %arg12[%c0_3, %c0_4, %c0_5, %c0_6] : memref<1x2x2x128xf32, #tpu.memory_space<vmem>>, vector<1x2x2x128xf32>
    %3 = vector.shape_cast %2 : vector<1x2x2x128xf32> to vector<2x2x128xf32>
    %4 = vector.shape_cast %1 : vector<2x2x128xf32> to vector<1x2x2x128xf32>
    tpu.vector_store %arg12[%c0_3, %c0_4, %c0_5, %c0_6], %4 {strides = array<i32>} : memref<1x2x2x128xf32, #tpu.memory_space<vmem>>, vector<1x2x2x128xf32>,
    %c0_i32 = arith.constant 0 : i32
    %5 = arith.addi %c0_i32, %arg0 : i32
    %c1_i32 = arith.constant 1 : i32
    %6 = arith.muli %5, %c1_i32 : i32
    %7 = arith.addi %6, %arg2 : i32
    %8 = arith.index_cast %7 : i32 to index
    %9 = memref.load %arg6[%8] : memref<4xi32, #tpu.memory_space<smem>>
    %c0_i32_7 = arith.constant 0 : i32
    %10 = arith.cmpi sgt, %9, %c0_i32_7 : i32
    %11 = arith.extui %10 : i1 to i32
    %c0_i32_8 = arith.constant 0 : i32
    %12 = arith.cmpi ne, %11, %c0_i32_8 : i32
    scf.if %12 {
      %c0_28 = arith.constant 0 : index
      %c0_29 = arith.constant 0 : index
      %c0_30 = arith.constant 0 : index
      %c0_31 = arith.constant 0 : index
      %37 = vector.load %arg12[%c0_28, %c0_29, %c0_30, %c0_31] : memref<1x2x2x128xf32, #tpu.memory_space<vmem>>, vector<1x2x2x128xf32>
      %38 = vector.shape_cast %37 : vector<1x2x2x128xf32> to vector<2x2x128xf32>
      %c0_i32_32 = arith.constant 0 : i32
      %39 = arith.addi %c0_i32_32, %arg0 : i32
      %c1_i32_33 = arith.constant 1 : i32
      %40 = arith.muli %39, %c1_i32_33 : i32
      %41 = arith.addi %40, %arg2 : i32
      %42 = arith.index_cast %41 : i32 to index
      %43 = memref.load %arg4[%42] : memref<4xf32, #tpu.memory_space<smem>>
      %c0_34 = arith.constant 0 : index
      %c0_35 = arith.constant 0 : index
      %c0_36 = arith.constant 0 : index
      %c0_37 = arith.constant 0 : index
      %44 = vector.load %arg7[%c0_34, %c0_35, %c0_36, %c0_37] : memref<1x2x2x128xf32, #tpu.memory_space<vmem>>, vector<1x2x2x128xf32>
      %45 = vector.shape_cast %44 : vector<1x2x2x128xf32> to vector<2x2x128xf32>
      %46 = arith.subf %45, %1 : vector<2x2x128xf32>
      %47 = arith.index_cast %41 : i32 to index
      %48 = memref.load %arg5[%47] : memref<4xf32, #tpu.memory_space<smem>>
      %cst_38 = arith.constant dense<0.000000e+00> : vector<2x2xf32>
      %49 = vector.multi_reduction <add>, %46, %cst_38 [2] : vector<2x2x128xf32> to vector<2x2xf32>
      %50 = vector.shape_cast %49 : vector<2x2xf32> to vector<2x2x1xf32>
      %cst_39 = arith.constant dense<0.000000e+00> : vector<2x1xf32>
      %51 = vector.multi_reduction <add>, %50, %cst_39 [1] : vector<2x2x1xf32> to vector<2x1xf32>
      %52 = vector.shape_cast %51 : vector<2x1xf32> to vector<2x1x1xf32>
      %cst_40 = arith.constant 3.906250e-03 : f32
      %53 = vector.broadcast %cst_40 : f32 to vector<2x1x1xf32>
      %54 = arith.mulf %52, %53 : vector<2x1x1xf32>
      %55 = vector.broadcast %54 : vector<2x1x1xf32> to vector<2x2x128xf32>
      %56 = arith.subf %46, %55 : vector<2x2x128xf32>
      %57 = math.absf %56 : vector<2x2x128xf32>
      %cst_41 = arith.constant 0.000000e+00 : f32
      %58 = vector.broadcast %cst_41 : f32 to vector<2x1x1xf32>
      %cst_42 = arith.constant dense<0xFF800000> : vector<2x2xf32>
      %59 = vector.multi_reduction <maximumf>, %57, %cst_42 [2] : vector<2x2x128xf32> to vector<2x2xf32>
      %60 = vector.shape_cast %59 : vector<2x2xf32> to vector<2x2x1xf32>
      %cst_43 = arith.constant dense<0xFF800000> : vector<2x1xf32>
      %61 = vector.multi_reduction <maximumf>, %60, %cst_43 [1] : vector<2x2x1xf32> to vector<2x1xf32>
      %62 = vector.shape_cast %61 : vector<2x1xf32> to vector<2x1x1xf32>
      %63 = vector.broadcast %62 : vector<2x1x1xf32> to vector<2x2x128xf32>
      %64 = arith.cmpf oeq, %57, %63 : vector<2x2x128xf32>
      %65 = arith.extui %64 : vector<2x2x128xi1> to vector<2x2x128xi32>
      %66 = arith.sitofp %65 : vector<2x2x128xi32> to vector<2x2x128xf32>
      %cst_44 = arith.constant dense<0.000000e+00> : vector<2x2xf32>
      %67 = vector.multi_reduction <add>, %66, %cst_44 [2] : vector<2x2x128xf32> to vector<2x2xf32>
      %68 = vector.shape_cast %67 : vector<2x2xf32> to vector<2x2x1xf32>
      %cst_45 = arith.constant dense<0.000000e+00> : vector<2x1xf32>
      %69 = vector.multi_reduction <add>, %68, %cst_45 [1] : vector<2x2x1xf32> to vector<2x1xf32>
      %70 = vector.shape_cast %69 : vector<2x1xf32> to vector<2x1x1xf32>
      %71 = arith.addf %58, %70 : vector<2x1x1xf32>
      %cst_46 = arith.constant 1.000000e+00 : f32
      %72 = vector.broadcast %cst_46 : f32 to vector<2x1x1xf32>
      %73 = arith.cmpf ole, %58, %72 : vector<2x1x1xf32>
      %cst_47 = arith.constant 1.000000e+00 : f32
      %74 = vector.broadcast %cst_47 : f32 to vector<2x1x1xf32>
      %75 = arith.cmpf ogt, %71, %74 : vector<2x1x1xf32>
      %76 = arith.andi %73, %75 : vector<2x1x1xi1>
      %cst_48 = arith.constant 0.000000e+00 : f32
      %77 = vector.broadcast %cst_48 : f32 to vector<2x1x1xf32>
      %78 = arith.cmpf ole, %58, %77 : vector<2x1x1xf32>
      %cst_49 = arith.constant 0.000000e+00 : f32
      %79 = vector.broadcast %cst_49 : f32 to vector<2x1x1xf32>
      %80 = arith.cmpf ogt, %71, %79 : vector<2x1x1xf32>
      %81 = arith.andi %78, %80 : vector<2x1x1xi1>
      %cst_50 = arith.constant 5.000000e-01 : f32
      %82 = vector.broadcast %cst_50 : f32 to vector<2x1x1xf32>
      %83 = arith.cmpf olt, %58, %82 : vector<2x1x1xf32>
      %84 = arith.andi %83, %76 : vector<2x1x1xi1>
      %cst_51 = arith.constant 5.000000e-01 : f32
      %85 = vector.broadcast %cst_51 : f32 to vector<2x1x1xf32>
      %86 = arith.cmpf olt, %58, %85 : vector<2x1x1xf32>
      %87 = arith.andi %86, %81 : vector<2x1x1xi1>
      %88 = arith.select %84, %62, %58 : vector<2x1x1xi1>, vector<2x1x1xf32>
      %89 = arith.select %87, %62, %58 : vector<2x1x1xi1>, vector<2x1x1xf32>
      %90 = arith.extui %84 : vector<2x1x1xi1> to vector<2x1x1xi32>
      %91 = arith.sitofp %90 : vector<2x1x1xi32> to vector<2x1x1xf32>
      %92 = arith.maximumf %58, %91 : vector<2x1x1xf32>
      %93 = arith.extui %87 : vector<2x1x1xi1> to vector<2x1x1xi32>
      %94 = arith.sitofp %93 : vector<2x1x1xi32> to vector<2x1x1xf32>
      %95 = arith.maximumf %58, %94 : vector<2x1x1xf32>
      %cst_52 = arith.constant 1.000000e+00 : f32
      %96 = vector.broadcast %cst_52 : f32 to vector<2x2x128xf32>
      %97 = arith.subf %96, %66 : vector<2x2x128xf32>
      %98 = arith.mulf %57, %97 : vector<2x2x128xf32>
      %cst_53 = arith.constant dense<0xFF800000> : vector<2x2xf32>
      %99 = vector.multi_reduction <maximumf>, %98, %cst_53 [2] : vector<2x2x128xf32> to vector<2x2xf32>
      %100 = vector.shape_cast %99 : vector<2x2xf32> to vector<2x2x1xf32>
      %cst_54 = arith.constant dense<0xFF800000> : vector<2x1xf32>
      %101 = vector.multi_reduction <maximumf>, %100, %cst_54 [1] : vector<2x2x1xf32> to vector<2x1xf32>
      %102 = vector.shape_cast %101 : vector<2x1xf32> to vector<2x1x1xf32>
      %103 = vector.broadcast %102 : vector<2x1x1xf32> to vector<2x2x128xf32>
      %104 = arith.cmpf oeq, %98, %103 : vector<2x2x128xf32>
      %105 = arith.extui %104 : vector<2x2x128xi1> to vector<2x2x128xi32>
      %106 = arith.sitofp %105 : vector<2x2x128xi32> to vector<2x2x128xf32>
      %cst_55 = arith.constant dense<0.000000e+00> : vector<2x2xf32>
      %107 = vector.multi_reduction <add>, %106, %cst_55 [2] : vector<2x2x128xf32> to vector<2x2xf32>
      %108 = vector.shape_cast %107 : vector<2x2xf32> to vector<2x2x1xf32>
      %cst_56 = arith.constant dense<0.000000e+00> : vector<2x1xf32>
      %109 = vector.multi_reduction <add>, %108, %cst_56 [1] : vector<2x2x1xf32> to vector<2x1xf32>
      %110 = vector.shape_cast %109 : vector<2x1xf32> to vector<2x1x1xf32>
      %111 = arith.addf %71, %110 : vector<2x1x1xf32>
      %cst_57 = arith.constant 1.000000e+00 : f32
      %112 = vector.broadcast %cst_57 : f32 to vector<2x1x1xf32>
      %113 = arith.cmpf ole, %71, %112 : vector<2x1x1xf32>
      %cst_58 = arith.constant 1.000000e+00 : f32
      %114 = vector.broadcast %cst_58 : f32 to vector<2x1x1xf32>
      %115 = arith.cmpf ogt, %111, %114 : vector<2x1x1xf32>
      %116 = arith.andi %113, %115 : vector<2x1x1xi1>
      %cst_59 = arith.constant 0.000000e+00 : f32
      %117 = vector.broadcast %cst_59 : f32 to vector<2x1x1xf32>
      %118 = arith.cmpf ole, %71, %117 : vector<2x1x1xf32>
      %cst_60 = arith.constant 0.000000e+00 : f32
      %119 = vector.broadcast %cst_60 : f32 to vector<2x1x1xf32>
      %120 = arith.cmpf ogt, %111, %119 : vector<2x1x1xf32>
      %121 = arith.andi %118, %120 : vector<2x1x1xi1>
      %cst_61 = arith.constant 5.000000e-01 : f32
      %122 = vector.broadcast %cst_61 : f32 to vector<2x1x1xf32>
      %123 = arith.cmpf olt, %92, %122 : vector<2x1x1xf32>
      %124 = arith.andi %123, %116 : vector<2x1x1xi1>
      %cst_62 = arith.constant 5.000000e-01 : f32
      %125 = vector.broadcast %cst_62 : f32 to vector<2x1x1xf32>
      %126 = arith.cmpf olt, %95, %125 : vector<2x1x1xf32>
      %127 = arith.andi %126, %121 : vector<2x1x1xi1>
      %128 = arith.select %124, %102, %88 : vector<2x1x1xi1>, vector<2x1x1xf32>
      %129 = arith.select %127, %102, %89 : vector<2x1x1xi1>, vector<2x1x1xf32>
      %130 = arith.subf %129, %128 : vector<2x1x1xf32>
      %cst_63 = arith.constant 8.725000e-01 : f32
      %131 = vector.broadcast %cst_63 : f32 to vector<2x1x1xf32>
      %132 = arith.mulf %131, %130 : vector<2x1x1xf32>
      %133 = arith.addf %128, %132 : vector<2x1x1xf32>
      %134 = math.absf %48 : f32
      %135 = vector.broadcast %134 : f32 to vector<2x1x1xf32>
      %136 = arith.mulf %135, %133 : vector<2x1x1xf32>
      %137 = math.absf %43 : f32
      %138 = vector.broadcast %137 : f32 to vector<2x1x1xf32>
      %139 = arith.mulf %138, %133 : vector<2x1x1xf32>
      %140 = arith.maximumf %139, %136 : vector<2x1x1xf32>
      %141 = arith.divf %136, %140 : vector<2x1x1xf32>
      %142 = vector.broadcast %141 : vector<2x1x1xf32> to vector<2x2x128xf32>
      %143 = arith.mulf %56, %142 : vector<2x2x128xf32>
      %144 = vector.broadcast %54 : vector<2x1x1xf32> to vector<2x2x128xf32>
      %145 = arith.addf %143, %144 : vector<2x2x128xf32>
      %146 = vector.broadcast %43 : f32 to vector<2x2x128xf32>
      %147 = arith.mulf %145, %146 : vector<2x2x128xf32>
      %148 = arith.addf %38, %147 : vector<2x2x128xf32>
      %c0_64 = arith.constant 0 : index
      %c0_65 = arith.constant 0 : index
      %c0_66 = arith.constant 0 : index
      %c0_67 = arith.constant 0 : index
      %149 = vector.load %arg12[%c0_64, %c0_65, %c0_66, %c0_67] : memref<1x2x2x128xf32, #tpu.memory_space<vmem>>, vector<1x2x2x128xf32>
      %150 = vector.shape_cast %149 : vector<1x2x2x128xf32> to vector<2x2x128xf32>
      %151 = vector.shape_cast %148 : vector<2x2x128xf32> to vector<1x2x2x128xf32>
      tpu.vector_store %arg12[%c0_64, %c0_65, %c0_66, %c0_67], %151 {strides = array<i32>} : memref<1x2x2x128xf32, #tpu.memory_space<vmem>>, vector<1x2x2x128xf32>,
    } else {
    }
    %c2_i32 = arith.constant 2 : i32
    %13 = arith.addi %c2_i32, %arg0 : i32
    %c1_i32_9 = arith.constant 1 : i32
    %14 = arith.muli %13, %c1_i32_9 : i32
    %15 = arith.addi %14, %arg2 : i32
    %16 = arith.index_cast %15 : i32 to index
    %17 = memref.load %arg6[%16] : memref<4xi32, #tpu.memory_space<smem>>
    %c0_i32_10 = arith.constant 0 : i32
    %18 = arith.cmpi sgt, %17, %c0_i32_10 : i32
    %19 = arith.extui %18 : i1 to i32
    %c0_i32_11 = arith.constant 0 : i32
    %20 = arith.cmpi ne, %19, %c0_i32_11 : i32
    scf.if %20 {
      %c0_28 = arith.constant 0 : index
      %c0_29 = arith.constant 0 : index
      %c0_30 = arith.constant 0 : index
      %c0_31 = arith.constant 0 : index
      %37 = vector.load %arg12[%c0_28, %c0_29, %c0_30, %c0_31] : memref<1x2x2x128xf32, #tpu.memory_space<vmem>>, vector<1x2x2x128xf32>
      %38 = vector.shape_cast %37 : vector<1x2x2x128xf32> to vector<2x2x128xf32>
      %c2_i32_32 = arith.constant 2 : i32
      %39 = arith.addi %c2_i32_32, %arg0 : i32
      %c1_i32_33 = arith.constant 1 : i32
      %40 = arith.muli %39, %c1_i32_33 : i32
      %41 = arith.addi %40, %arg2 : i32
      %42 = arith.index_cast %41 : i32 to index
      %43 = memref.load %arg4[%42] : memref<4xf32, #tpu.memory_space<smem>>
      %c0_34 = arith.constant 0 : index
      %c0_35 = arith.constant 0 : index
      %c0_36 = arith.constant 0 : index
      %c0_37 = arith.constant 0 : index
      %44 = vector.load %arg8[%c0_34, %c0_35, %c0_36, %c0_37] : memref<1x2x2x128xf32, #tpu.memory_space<vmem>>, vector<1x2x2x128xf32>
      %45 = vector.shape_cast %44 : vector<1x2x2x128xf32> to vector<2x2x128xf32>
      %46 = arith.subf %45, %1 : vector<2x2x128xf32>
      %47 = arith.index_cast %41 : i32 to index
      %48 = memref.load %arg5[%47] : memref<4xf32, #tpu.memory_space<smem>>
      %cst_38 = arith.constant dense<0.000000e+00> : vector<2x2xf32>
      %49 = vector.multi_reduction <add>, %46, %cst_38 [2] : vector<2x2x128xf32> to vector<2x2xf32>
      %50 = vector.shape_cast %49 : vector<2x2xf32> to vector<2x2x1xf32>
      %cst_39 = arith.constant dense<0.000000e+00> : vector<2x1xf32>
      %51 = vector.multi_reduction <add>, %50, %cst_39 [1] : vector<2x2x1xf32> to vector<2x1xf32>
      %52 = vector.shape_cast %51 : vector<2x1xf32> to vector<2x1x1xf32>
      %cst_40 = arith.constant 3.906250e-03 : f32
      %53 = vector.broadcast %cst_40 : f32 to vector<2x1x1xf32>
      %54 = arith.mulf %52, %53 : vector<2x1x1xf32>
      %55 = vector.broadcast %54 : vector<2x1x1xf32> to vector<2x2x128xf32>
      %56 = arith.subf %46, %55 : vector<2x2x128xf32>
      %57 = math.absf %56 : vector<2x2x128xf32>
      %cst_41 = arith.constant 0.000000e+00 : f32
      %58 = vector.broadcast %cst_41 : f32 to vector<2x1x1xf32>
      %cst_42 = arith.constant dense<0xFF800000> : vector<2x2xf32>
      %59 = vector.multi_reduction <maximumf>, %57, %cst_42 [2] : vector<2x2x128xf32> to vector<2x2xf32>
      %60 = vector.shape_cast %59 : vector<2x2xf32> to vector<2x2x1xf32>
      %cst_43 = arith.constant dense<0xFF800000> : vector<2x1xf32>
      %61 = vector.multi_reduction <maximumf>, %60, %cst_43 [1] : vector<2x2x1xf32> to vector<2x1xf32>
      %62 = vector.shape_cast %61 : vector<2x1xf32> to vector<2x1x1xf32>
      %63 = vector.broadcast %62 : vector<2x1x1xf32> to vector<2x2x128xf32>
      %64 = arith.cmpf oeq, %57, %63 : vector<2x2x128xf32>
      %65 = arith.extui %64 : vector<2x2x128xi1> to vector<2x2x128xi32>
      %66 = arith.sitofp %65 : vector<2x2x128xi32> to vector<2x2x128xf32>
      %cst_44 = arith.constant dense<0.000000e+00> : vector<2x2xf32>
      %67 = vector.multi_reduction <add>, %66, %cst_44 [2] : vector<2x2x128xf32> to vector<2x2xf32>
      %68 = vector.shape_cast %67 : vector<2x2xf32> to vector<2x2x1xf32>
      %cst_45 = arith.constant dense<0.000000e+00> : vector<2x1xf32>
      %69 = vector.multi_reduction <add>, %68, %cst_45 [1] : vector<2x2x1xf32> to vector<2x1xf32>
      %70 = vector.shape_cast %69 : vector<2x1xf32> to vector<2x1x1xf32>
      %71 = arith.addf %58, %70 : vector<2x1x1xf32>
      %cst_46 = arith.constant 1.000000e+00 : f32
      %72 = vector.broadcast %cst_46 : f32 to vector<2x1x1xf32>
      %73 = arith.cmpf ole, %58, %72 : vector<2x1x1xf32>
      %cst_47 = arith.constant 1.000000e+00 : f32
      %74 = vector.broadcast %cst_47 : f32 to vector<2x1x1xf32>
      %75 = arith.cmpf ogt, %71, %74 : vector<2x1x1xf32>
      %76 = arith.andi %73, %75 : vector<2x1x1xi1>
      %cst_48 = arith.constant 0.000000e+00 : f32
      %77 = vector.broadcast %cst_48 : f32 to vector<2x1x1xf32>
      %78 = arith.cmpf ole, %58, %77 : vector<2x1x1xf32>
      %cst_49 = arith.constant 0.000000e+00 : f32
      %79 = vector.broadcast %cst_49 : f32 to vector<2x1x1xf32>
      %80 = arith.cmpf ogt, %71, %79 : vector<2x1x1xf32>
      %81 = arith.andi %78, %80 : vector<2x1x1xi1>
      %cst_50 = arith.constant 5.000000e-01 : f32
      %82 = vector.broadcast %cst_50 : f32 to vector<2x1x1xf32>
      %83 = arith.cmpf olt, %58, %82 : vector<2x1x1xf32>
      %84 = arith.andi %83, %76 : vector<2x1x1xi1>
      %cst_51 = arith.constant 5.000000e-01 : f32
      %85 = vector.broadcast %cst_51 : f32 to vector<2x1x1xf32>
      %86 = arith.cmpf olt, %58, %85 : vector<2x1x1xf32>
      %87 = arith.andi %86, %81 : vector<2x1x1xi1>
      %88 = arith.select %84, %62, %58 : vector<2x1x1xi1>, vector<2x1x1xf32>
      %89 = arith.select %87, %62, %58 : vector<2x1x1xi1>, vector<2x1x1xf32>
      %90 = arith.extui %84 : vector<2x1x1xi1> to vector<2x1x1xi32>
      %91 = arith.sitofp %90 : vector<2x1x1xi32> to vector<2x1x1xf32>
      %92 = arith.maximumf %58, %91 : vector<2x1x1xf32>
      %93 = arith.extui %87 : vector<2x1x1xi1> to vector<2x1x1xi32>
      %94 = arith.sitofp %93 : vector<2x1x1xi32> to vector<2x1x1xf32>
      %95 = arith.maximumf %58, %94 : vector<2x1x1xf32>
      %cst_52 = arith.constant 1.000000e+00 : f32
      %96 = vector.broadcast %cst_52 : f32 to vector<2x2x128xf32>
      %97 = arith.subf %96, %66 : vector<2x2x128xf32>
      %98 = arith.mulf %57, %97 : vector<2x2x128xf32>
      %cst_53 = arith.constant dense<0xFF800000> : vector<2x2xf32>
      %99 = vector.multi_reduction <maximumf>, %98, %cst_53 [2] : vector<2x2x128xf32> to vector<2x2xf32>
      %100 = vector.shape_cast %99 : vector<2x2xf32> to vector<2x2x1xf32>
      %cst_54 = arith.constant dense<0xFF800000> : vector<2x1xf32>
      %101 = vector.multi_reduction <maximumf>, %100, %cst_54 [1] : vector<2x2x1xf32> to vector<2x1xf32>
      %102 = vector.shape_cast %101 : vector<2x1xf32> to vector<2x1x1xf32>
      %103 = vector.broadcast %102 : vector<2x1x1xf32> to vector<2x2x128xf32>
      %104 = arith.cmpf oeq, %98, %103 : vector<2x2x128xf32>
      %105 = arith.extui %104 : vector<2x2x128xi1> to vector<2x2x128xi32>
      %106 = arith.sitofp %105 : vector<2x2x128xi32> to vector<2x2x128xf32>
      %cst_55 = arith.constant dense<0.000000e+00> : vector<2x2xf32>
      %107 = vector.multi_reduction <add>, %106, %cst_55 [2] : vector<2x2x128xf32> to vector<2x2xf32>
      %108 = vector.shape_cast %107 : vector<2x2xf32> to vector<2x2x1xf32>
      %cst_56 = arith.constant dense<0.000000e+00> : vector<2x1xf32>
      %109 = vector.multi_reduction <add>, %108, %cst_56 [1] : vector<2x2x1xf32> to vector<2x1xf32>
      %110 = vector.shape_cast %109 : vector<2x1xf32> to vector<2x1x1xf32>
      %111 = arith.addf %71, %110 : vector<2x1x1xf32>
      %cst_57 = arith.constant 1.000000e+00 : f32
      %112 = vector.broadcast %cst_57 : f32 to vector<2x1x1xf32>
      %113 = arith.cmpf ole, %71, %112 : vector<2x1x1xf32>
      %cst_58 = arith.constant 1.000000e+00 : f32
      %114 = vector.broadcast %cst_58 : f32 to vector<2x1x1xf32>
      %115 = arith.cmpf ogt, %111, %114 : vector<2x1x1xf32>
      %116 = arith.andi %113, %115 : vector<2x1x1xi1>
      %cst_59 = arith.constant 0.000000e+00 : f32
      %117 = vector.broadcast %cst_59 : f32 to vector<2x1x1xf32>
      %118 = arith.cmpf ole, %71, %117 : vector<2x1x1xf32>
      %cst_60 = arith.constant 0.000000e+00 : f32
      %119 = vector.broadcast %cst_60 : f32 to vector<2x1x1xf32>
      %120 = arith.cmpf ogt, %111, %119 : vector<2x1x1xf32>
      %121 = arith.andi %118, %120 : vector<2x1x1xi1>
      %cst_61 = arith.constant 5.000000e-01 : f32
      %122 = vector.broadcast %cst_61 : f32 to vector<2x1x1xf32>
      %123 = arith.cmpf olt, %92, %122 : vector<2x1x1xf32>
      %124 = arith.andi %123, %116 : vector<2x1x1xi1>
      %cst_62 = arith.constant 5.000000e-01 : f32
      %125 = vector.broadcast %cst_62 : f32 to vector<2x1x1xf32>
      %126 = arith.cmpf olt, %95, %125 : vector<2x1x1xf32>
      %127 = arith.andi %126, %121 : vector<2x1x1xi1>
      %128 = arith.select %124, %102, %88 : vector<2x1x1xi1>, vector<2x1x1xf32>
      %129 = arith.select %127, %102, %89 : vector<2x1x1xi1>, vector<2x1x1xf32>
      %130 = arith.subf %129, %128 : vector<2x1x1xf32>
      %cst_63 = arith.constant 8.725000e-01 : f32
      %131 = vector.broadcast %cst_63 : f32 to vector<2x1x1xf32>
      %132 = arith.mulf %131, %130 : vector<2x1x1xf32>
      %133 = arith.addf %128, %132 : vector<2x1x1xf32>
      %134 = math.absf %48 : f32
      %135 = vector.broadcast %134 : f32 to vector<2x1x1xf32>
      %136 = arith.mulf %135, %133 : vector<2x1x1xf32>
      %137 = math.absf %43 : f32
      %138 = vector.broadcast %137 : f32 to vector<2x1x1xf32>
      %139 = arith.mulf %138, %133 : vector<2x1x1xf32>
      %140 = arith.maximumf %139, %136 : vector<2x1x1xf32>
      %141 = arith.divf %136, %140 : vector<2x1x1xf32>
      %142 = vector.broadcast %141 : vector<2x1x1xf32> to vector<2x2x128xf32>
      %143 = arith.mulf %56, %142 : vector<2x2x128xf32>
      %144 = vector.broadcast %54 : vector<2x1x1xf32> to vector<2x2x128xf32>
      %145 = arith.addf %143, %144 : vector<2x2x128xf32>
      %146 = vector.broadcast %43 : f32 to vector<2x2x128xf32>
      %147 = arith.mulf %145, %146 : vector<2x2x128xf32>
      %148 = arith.addf %38, %147 : vector<2x2x128xf32>
      %c0_64 = arith.constant 0 : index
      %c0_65 = arith.constant 0 : index
      %c0_66 = arith.constant 0 : index
      %c0_67 = arith.constant 0 : index
      %149 = vector.load %arg12[%c0_64, %c0_65, %c0_66, %c0_67] : memref<1x2x2x128xf32, #tpu.memory_space<vmem>>, vector<1x2x2x128xf32>
      %150 = vector.shape_cast %149 : vector<1x2x2x128xf32> to vector<2x2x128xf32>
      %151 = vector.shape_cast %148 : vector<2x2x128xf32> to vector<1x2x2x128xf32>
      tpu.vector_store %arg12[%c0_64, %c0_65, %c0_66, %c0_67], %151 {strides = array<i32>} : memref<1x2x2x128xf32, #tpu.memory_space<vmem>>, vector<1x2x2x128xf32>,
    } else {
    }
    %c0_12 = arith.constant 0 : index
    %c0_13 = arith.constant 0 : index
    %c0_14 = arith.constant 0 : index
    %c0_15 = arith.constant 0 : index
    %21 = vector.load %arg11[%c0_12, %c0_13, %c0_14, %c0_15] : memref<1x1x2x128xf32, #tpu.memory_space<vmem>>, vector<1x1x2x128xf32>
    %22 = vector.shape_cast %21 : vector<1x1x2x128xf32> to vector<1x2x128xf32>
    %c0_16 = arith.constant 0 : index
    %c0_17 = arith.constant 0 : index
    %c0_18 = arith.constant 0 : index
    %c0_19 = arith.constant 0 : index
    %23 = vector.load %arg10[%c0_16, %c0_17, %c0_18, %c0_19] : memref<1x2x2x128xf32, #tpu.memory_space<vmem>>, vector<1x2x2x128xf32>
    %24 = vector.shape_cast %23 : vector<1x2x2x128xf32> to vector<2x2x128xf32>
    %25 = vector.broadcast %22 : vector<1x2x128xf32> to vector<2x2x128xf32>
    %26 = arith.mulf %24, %25 : vector<2x2x128xf32>
    %c0_20 = arith.constant 0 : index
    %c0_21 = arith.constant 0 : index
    %c0_22 = arith.constant 0 : index
    %c0_23 = arith.constant 0 : index
    %27 = vector.load %arg12[%c0_20, %c0_21, %c0_22, %c0_23] : memref<1x2x2x128xf32, #tpu.memory_space<vmem>>, vector<1x2x2x128xf32>
    %28 = vector.shape_cast %27 : vector<1x2x2x128xf32> to vector<2x2x128xf32>
    %cst = arith.constant 1.000000e+00 : f32
    %29 = vector.broadcast %cst : f32 to vector<1x2x128xf32>
    %30 = arith.subf %29, %22 : vector<1x2x128xf32>
    %31 = vector.broadcast %30 : vector<1x2x128xf32> to vector<2x2x128xf32>
    %32 = arith.mulf %28, %31 : vector<2x2x128xf32>
    %33 = arith.addf %26, %32 : vector<2x2x128xf32>
    %c0_24 = arith.constant 0 : index
    %c0_25 = arith.constant 0 : index
    %c0_26 = arith.constant 0 : index
    %c0_27 = arith.constant 0 : index
    %34 = vector.load %arg12[%c0_24, %c0_25, %c0_26, %c0_27] : memref<1x2x2x128xf32, #tpu.memory_space<vmem>>, vector<1x2x2x128xf32>
    %35 = vector.shape_cast %34 : vector<1x2x2x128xf32> to vector<2x2x128xf32>
    %36 = vector.shape_cast %33 : vector<2x2x128xf32> to vector<1x2x2x128xf32>
    tpu.vector_store %arg12[%c0_24, %c0_25, %c0_26, %c0_27], %36 {strides = array<i32>} : memref<1x2x2x128xf32, #tpu.memory_space<vmem>>, vector<1x2x2x128xf32>,
    return
  }
  func.func @transform_0(%arg0: i32, %arg1: i32, %arg2: i32, %arg3: memref<4xi32, #tpu.memory_space<smem>>, %arg4: memref<4xf32, #tpu.memory_space<smem>>, %arg5: memref<4xf32, #tpu.memory_space<smem>>, %arg6: memref<4xi32, #tpu.memory_space<smem>>) -> (i32, i32, i32, i32) {
    %c0_i32 = arith.constant 0 : i32
    %0 = arith.addi %c0_i32, %arg0 : i32
    %c1_i32 = arith.constant 1 : i32
    %1 = arith.muli %0, %c1_i32 : i32
    %2 = arith.addi %1, %arg2 : i32
    %3 = arith.index_cast %2 : i32 to index
    %4 = memref.load %arg3[%3] : memref<4xi32, #tpu.memory_space<smem>>
    %c0_i32_0 = arith.constant 0 : i32
    %c0_i32_1 = arith.constant 0 : i32
    %c0_i32_2 = arith.constant 0 : i32
    return %4, %arg1, %c0_i32_0, %c0_i32_1 : i32, i32, i32, i32
  }
  func.func @transform_1(%arg0: i32, %arg1: i32, %arg2: i32, %arg3: memref<4xi32, #tpu.memory_space<smem>>, %arg4: memref<4xf32, #tpu.memory_space<smem>>, %arg5: memref<4xf32, #tpu.memory_space<smem>>, %arg6: memref<4xi32, #tpu.memory_space<smem>>) -> (i32, i32, i32, i32) {
    %c2_i32 = arith.constant 2 : i32
    %0 = arith.addi %c2_i32, %arg0 : i32
    %c1_i32 = arith.constant 1 : i32
    %1 = arith.muli %0, %c1_i32 : i32
    %2 = arith.addi %1, %arg2 : i32
    %3 = arith.index_cast %2 : i32 to index
    %4 = memref.load %arg3[%3] : memref<4xi32, #tpu.memory_space<smem>>
    %c0_i32 = arith.constant 0 : i32
    %c0_i32_0 = arith.constant 0 : i32
    %c0_i32_1 = arith.constant 0 : i32
    return %4, %arg1, %c0_i32, %c0_i32_0 : i32, i32, i32, i32
  }
  func.func @transform_2(%arg0: i32, %arg1: i32, %arg2: i32, %arg3: memref<4xi32, #tpu.memory_space<smem>>, %arg4: memref<4xf32, #tpu.memory_space<smem>>, %arg5: memref<4xf32, #tpu.memory_space<smem>>, %arg6: memref<4xi32, #tpu.memory_space<smem>>) -> (i32, i32, i32, i32) {
    %c0_i32 = arith.constant 0 : i32
    %c0_i32_0 = arith.constant 0 : i32
    %c0_i32_1 = arith.constant 0 : i32
    return %arg0, %arg1, %c0_i32, %c0_i32_0 : i32, i32, i32, i32
  }
  func.func @transform_3(%arg0: i32, %arg1: i32, %arg2: i32, %arg3: memref<4xi32, #tpu.memory_space<smem>>, %arg4: memref<4xf32, #tpu.memory_space<smem>>, %arg5: memref<4xf32, #tpu.memory_space<smem>>, %arg6: memref<4xi32, #tpu.memory_space<smem>>) -> (i32, i32, i32, i32) {
    %c0_i32 = arith.constant 0 : i32
    %c0_i32_0 = arith.constant 0 : i32
    %c0_i32_1 = arith.constant 0 : i32
    return %arg0, %arg1, %c0_i32, %c0_i32_0 : i32, i32, i32, i32
  }
  func.func @transform_4(%arg0: i32, %arg1: i32, %arg2: i32, %arg3: memref<4xi32, #tpu.memory_space<smem>>, %arg4: memref<4xf32, #tpu.memory_space<smem>>, %arg5: memref<4xf32, #tpu.memory_space<smem>>, %arg6: memref<4xi32, #tpu.memory_space<smem>>) -> (i32, i32, i32, i32) {
    %c0_i32 = arith.constant 0 : i32
    %c0_i32_0 = arith.constant 0 : i32
    %c0_i32_1 = arith.constant 0 : i32
    %c0_i32_2 = arith.constant 0 : i32
    return %arg0, %c0_i32, %c0_i32_0, %c0_i32_1 : i32, i32, i32, i32
  }
  func.func @transform_5(%arg0: i32, %arg1: i32, %arg2: i32, %arg3: memref<4xi32, #tpu.memory_space<smem>>, %arg4: memref<4xf32, #tpu.memory_space<smem>>, %arg5: memref<4xf32, #tpu.memory_space<smem>>, %arg6: memref<4xi32, #tpu.memory_space<smem>>) -> (i32, i32, i32, i32) {
    %c0_i32 = arith.constant 0 : i32
    %c0_i32_0 = arith.constant 0 : i32
    %c0_i32_1 = arith.constant 0 : i32
    return %arg0, %arg1, %c0_i32, %c0_i32_0 : i32, i32, i32, i32
  }
}

</mosaic_0001>

<bundles_post_ra>
// kernel: tpu_custom_call.1
= control target key start
LH: loop header
LB: loop body
LE: loop exit
PB: predicated region body
PF: predicated region fallthrough
CT: control target
= control target key end

     0   :  { %s1662_s30 = smov [#allocation3]   ;;  %s2404_s0 = inlined_call_operand.hbm [shape: s32[4], index: 0, kind: input, shape index: {}]   ;;  %s2405_s4 = inlined_call_operand.hbm [shape: f32[3,4,2,128], index: 4, kind: input, shape index: {}]   ;;  %s2406_s5 = inlined_call_operand.hbm [shape: f32[3,4,2,128], index: 5, kind: input, shape index: {}]   ;;  %s2407_s6 = inlined_call_operand.hbm [shape: f32[2,4,2,128], index: 6, kind: input, shape index: {}]   ;;  %s2408_s7 = inlined_call_operand.hbm [shape: f32[2,4,2,128], index: 7, kind: input, shape index: {}]   ;;  %s2409_s8 = inlined_call_operand.vmem [shape: f32[2,1,2,128], index: 8, kind: input, shape index: {}]   ;;  %s2410_s9 = inlined_call_operand.hbm [shape: f32[2,4,2,128], index: 9, kind: output, shape index: {}]   ;;  %s2411_s1 = inlined_call_operand.vmem [shape: f32[4], index: 1, kind: input, shape index: {}]   ;;  %s2412_s2 = inlined_call_operand.vmem [shape: f32[4], index: 2, kind: input, shape index: {}]   ;;  %s2413_s3 = inlined_call_operand.vmem [shape: s32[4], index: 3, kind: input, shape index: {}]  }
   0x1   :  { %2439 = sst [smem:[#allocation38_spill]] %s2405_s4  ;;  %s16_s14 = sshll.u32 %s2411_s1, 4  ;;  %s17_s14 = int_to_ptr.vmem [resolvable:$true] %s16_s14 }
   0x2   :  { %2440 = sst [smem:[#allocation39_spill]] %s2406_s5  ;;  %s20_s17 = sshll.u32 %s2412_s2, 4  ;;  %s21_s17 = int_to_ptr.vmem [resolvable:$true] %s20_s17 }
   0x3   :  { %2441 = sst [smem:[#allocation40_spill]] %s2407_s6  ;;  %s1354_s18 = scalar_lea.vmem %s17_s14, 16 }
   0x4   :  { %2442 = sst [smem:[#allocation41_spill]] %s2408_s7  ;;  %p1355_p0 = scmp.ne.s32.totalorder %s17_s14, %s1354_s18 }
   0x5   :  { %2443 = sst [smem:[#allocation42_spill]] %s2409_s8  ;;  %p1359_p1 = scmp.lt.s32.totalorder %s17_s14, %s17_s14 }
   0x6   :  { %2444 = sst [smem:[#allocation43_spill]] %s2410_s9  ;;  %p1360_p2 = scmp.lt.s32.totalorder %s1354_s18, %s1354_s18 }
   0x7   :  { %15 = dma.hbm_to_smem %s2404_s0, 16, %s1662_s30, [#allocation2] }
   0x8   :  { %p1361_p3 = por %p1360_p2, %p1359_p1 }
   0xa   :  { %p1362_p4 = pnand %p1361_p3, %p1355_p0 }
   0xc   :  { %1365 = shalt.err (!%p1362_p4)  }
   0xd   :  { %s1663_s19 = smov [#allocation4]   ;;  %s24_s21 = sshll.u32 %s2413_s3, 4  ;;  %s25_s21 = int_to_ptr.vmem [resolvable:$true] %s24_s21 }
   0xe   :  { %19 = dma.vmem_to_smem %s17_s14, 16, %s1663_s19, [#allocation2] }
   0xf   :  { %s1366_s1 = scalar_lea.vmem %s21_s17, 16  ;;  %p1371_p6 = scmp.lt.s32.totalorder %s21_s17, %s21_s17 }
  0x10   :  { %p1367_p5 = scmp.ne.s32.totalorder %s21_s17, %s1366_s1  ;;  %p1372_p7 = scmp.lt.s32.totalorder %s1366_s1, %s1366_s1 }
  0x12   :  { %p1373_p8 = por %p1372_p7, %p1371_p6 }
  0x14   :  { %p1374_p9 = pnand %p1373_p8, %p1367_p5 }
  0x16   :  { %1377 = shalt.err (!%p1374_p9)  }
  0x17   :  { %s1664_s2 = smov [#allocation5]   ;;  %s1378_s22 = scalar_lea.vmem %s25_s21, 16 }
  0x18   :  { %23 = dma.vmem_to_smem %s21_s17, 16, %s1664_s2, [#allocation2] }
  0x19   :  { %p1379_p10 = scmp.ne.s32.totalorder %s25_s21, %s1378_s22  ;;  %p1383_p11 = scmp.lt.s32.totalorder %s25_s21, %s25_s21 }
  0x1a   :  { %p1384_p12 = scmp.lt.s32.totalorder %s1378_s22, %s1378_s22 }
  0x1c   :  { %p1385_p13 = por %p1384_p12, %p1383_p11 }
  0x1e   :  { %p1386_p0 = pnand %p1385_p13, %p1379_p10 }
  0x20   :  { %1389 = shalt.err (!%p1386_p0)  }
  0x21   :  { %s1665_s23 = smov [#allocation6]  }
  0x22   :  { %27 = dma.vmem_to_smem %s25_s21, 16, %s1665_s23, [#allocation2] }
  0x23   :  { %1584 = dma.done.wait [#allocation2], 64 }
  0x24   :  { %1585 = vsyncadd [#allocation2], 4294967232 }
  0x25   :  { %29 = sfence }
  0x26   :  { %30 = vsyncpa [#allocation8], 0 }
  0x27   :  { %32 = vsyncpa [#allocation8 + $0x1], 0 }
  0x28   :  { %33 = vsyncpa [#allocation11], 0 }
  0x29   :  { %35 = vsyncpa [#allocation11 + $0x1], 0 }
  0x2a   :  { %36 = vsyncpa [#allocation14], 0 }
  0x2b   :  { %38 = vsyncpa [#allocation14 + $0x1], 0 }
  0x2c   :  { %39 = vsyncpa [#allocation9], 0 }
  0x2d   :  { %41 = vsyncpa [#allocation9 + $0x1], 0  ;;  %s1739_s3 = smov 0   ;;  %s1741_s24 = smov 0  }
  0x2e   :  { %s1743_s25 = smov 0   ;;  %s1745_s26 = smov 0  }
  0x2f   :  { %s1747_s27 = smov 0   ;;  %s1749_s28 = smov 0  }
  0x30   :  { %s1751_s29 = smov 0   ;;  %s1753_s30 = smov 0  }
  0x31   :  { %s1755_s10 = smov 0   ;;  %s1757_s11 = smov 0  }
  0x32   :  { %s1759_s12 = smov 0   ;;  %s1761_s13 = smov 0  }
  0x33   :  { %s1763_s14 = smov 0   ;;  %s1765_s15 = smov 0  }
  0x34 LB: > { %2445 = sst [smem:[#allocation26_spill]] %s1624_s27  ;;  %s1810_s16 = sadd.s32 4294967295, %s1660_s15   ;;  %s1660_s15 = sphi %s1765_s15, %s47_s15   ;;  %s1656_s14 = sphi %s1763_s14, %s2513_s14   ;;  %s1652_s13 = sphi %s1761_s13, %s2512_s13   ;;  %s1648_s12 = sphi %s1759_s12, %s2511_s12   ;;  %s1644_s11 = sphi %s1757_s11, %s2510_s11   ;;  %s1640_s10 = sphi %s1755_s10, %s2509_s10   ;;  %s1636_s30 = sphi %s1753_s30, %s2518_s30   ;;  %s1632_s29 = sphi %s1751_s29, %s2517_s29   ;;  %s1628_s28 = sphi %s1749_s28, %s2507_s28   ;;  %s1624_s27 = sphi %s1747_s27, %s2506_s27   ;;  %s1620_s26 = sphi %s1745_s26, %s2505_s26   ;;  %s1616_s25 = sphi %s1743_s25, %s2516_s25   ;;  %s1612_s24 = sphi %s1741_s24, %s2515_s24   ;;  %s1608_s3 = sphi %s1739_s3, %s2514_s3  }
  0x35   : > { %2446 = sst [smem:[#allocation27_spill]] %s1628_s28  ;;  %s62_s17 = sadd.s32 1, %s1652_s13 }
  0x36   : > { %2447 = sst [smem:[#allocation28_spill]] %s1640_s10  ;;  %p64_p1 = scmp.ge.s32.totalorder %s62_s17, 2 }
  0x37   : > { %2448 = sst [smem:[#allocation29_spill]] %s1644_s11  ;;  %s66_s18 = sadd.s32 1, %s1656_s14 }
  0x38   : > { %2449 = sst [smem:[#allocation30_spill]] %s1648_s12  ;;  %p2425_p2 = scmp.eq.s32.totalorder %s1660_s15, 0 }
  0x39   : > { %2450 = sst [smem:[#allocation31_spill]] %s1652_s13  ;;  %s2520_s17 = smov (%p64_p1, %s62_s17), 0 }
  0x3a   : > { %2451 = sst [smem:[#allocation32_spill]] %s1656_s14  ;;  %s2522_s18 = smov (!%p64_p1, %s66_s18), %s1656_s14 }
  0x3b   : > { %s71_s19 = sld [smem:[#allocation3 + %s1656_s14]]  ;;  %s75_s0 = ssub.s32 %s1652_s13, %s2520_s17 }
  0x3c   : > { %2452 = sst [smem:[#allocation33_spill]] %s2520_s17  ;;  %p2424_p3 = scmp.eq.s32.totalorder %s1810_s16, 0 }
  0x3d   : > { %p68_p4 = scmp.ge.s32.totalorder %s2522_s18, 2  ;;  %s102_s20 = sadd.s32 2, %s1656_s14 }
  0x3e   : > { %s104_s21 = sld [smem:[#allocation3 + %s102_s20]]  ;;  %s113_s1 = sadd.s32 1, %s1628_s28 }
  0x3f   : > { %s2524_s18 = smov (%p68_p4, %s2522_s18), 0  ;;  %p120_p5 = scmp.ne.s32.totalorder %s1628_s28, %s1624_s27 }
  0x40   : > { %2453 = sst [smem:[#allocation34_spill]] %s2524_s18  ;;  %p126_p6 = scmp.ne.s32.totalorder %s1624_s27, %s1620_s26 }
  0x41   : > { %s73_s2 = sld [smem:[#allocation3 + %s2524_s18]]  ;;  %s105_s22 = sadd.s32 2, %s2524_s18 }
  0x42   : > { %s107_s23 = sld [smem:[#allocation3 + %s105_s22]]  ;;  %p1834_p7 = por %p120_p5, %p2425_p2 }
  0x43   : > { %p1840_p8 = por %p126_p6, %p2424_p3  ;;  %s136_s11 = ssub.s32 %s1656_s14, %s2524_s18 }
  0x44   : > { %s1846_s26 = sor.u32 %s136_s11, %s75_s0  ;;  %p2423_p10 = scmp.lt.s32.totalorder %s1660_s15, 4 }
  0x45   : > { %s2455_s9 = scalar_select %p1840_p8, 1, 0 }
  0x46   : > { %s1851_s22 = sshll.u32 %s1652_s13, 1  ;;  %s285_s11 = sand.u32 1, %s1660_s15  }
  0x47   : > { %2456 = sst [smem:[#allocation35_spill]] %s2455_s9  ;;  %s74_s8 = ssub.s32 %s71_s19, %s73_s2 }
  0x48   : > { %s1853_s12 = sor.u32 %s75_s0, %s74_s8  ;;  %s108_s9 = ssub.s32 %s104_s21, %s107_s23 }
  0x49   : > { %s110_s27 = sor.u32 %s108_s9, %s75_s0  ;;  %s287_s18 = sand.u32 1, %s1628_s28  }
  0x4a   : > { %p111_p12 = scmp.eq.s32.totalorder %s110_s27, 0  ;;  %s1136_s6 = sshll.u32 %s287_s18, 2 }
  0x4b   : > { %p1865_p13 = pnand %p2423_p10, %p1834_p7  ;;  %p1148_p0 = scmp.ge.s32.totalorder %s1660_s15, 1 }
  0x4c   : > { %s1859_s7 = scalar_select %p111_p12, %s1628_s28, %s113_s1  }
  0x4d   : > { %s1182_s8 = scalar_select %p1834_p7, [#allocation3], [#allocation17] }
  0x4e   : > { %2457 = sst [smem:[#allocation36_spill]] %s1859_s7  ;;  %s2526_s20 = smov (!%p1834_p7, %s102_s20), 0 }
  0x4f   : > { %s2528_s8 = smov (!%p2423_p10, %s1182_s8), [#allocation19]  ;;  %s2530_s20 = smov (!%p2423_p10, %s2526_s20), 0 }
  0x50   : > { %s289_s9 = scalar_lea.vmem [#allocation10], %s1136_s6  ;;  %s292_s18 = sld [smem:[%s2528_s8 + %s2530_s20]] }
  0x51   : > { %s301_s27 = sshll.u32 %s289_s9, 4  ;;  %p362_p1 = scmp.lt.s32.totalorder %s1660_s15, 5  ;;  %s1878_s27 = int_to_ptr.vmem [resolvable:$true] %s301_s27 }
  0x52   : > { %s79_s17 = sadd.s32 1, %s1640_s10  ;;  %s2460_s5 = sld [smem:[#allocation39_spill]] }
  0x53   : > { %p1881_p4 = pnand %p1148_p0, %p362_p1  ;;  %s1894_s6 = scalar_lea.sflag [#allocation11], %s285_s11 }
  0x54   : > { %p1392_p7 = pneg %p1865_p13 }
  0x55   : > { %s2459_s19 = scalar_select %p1881_p4, 1, 0 }
  0x56   : > { %s1138_s0 = sshll.u32 %s292_s18, 2 }
  0x57   : > { %s298_s21 = sadd.s32 %s1138_s0, %s1851_s22 }
  0x58   : > { %s1139_s1 = sshll.u32 %s298_s21, 5  ;;  %s1395_s18 = scalar_lea.hbm %s2460_s5, 384 }
  0x59   : > { %s1890_s7 = scalar_lea.hbm %s2460_s5, %s1139_s1 }
  0x5a   : > { %s1390_s20 = scalar_lea.hbm %s1890_s7, 64  ;;  %p1396_p1 = scmp.lt.s32.totalorder %s1890_s7, %s2460_s5 }
  0x5b   : > { %p1391_p6 = scmp.ne.s32.totalorder %s1890_s7, %s1390_s20  ;;  %p1397_p9 = scmp.lt.s32.totalorder %s1395_s18, %s1390_s20 }
  0x5d   : > { %p1393_p12 = pnand %p1392_p7, %p1391_p6  ;;  %p1398_p10 = por %p1397_p9, %p1396_p1 }
  0x5f   : > { %p1394_p0 = pneg %p1393_p12 }
  0x61   : > { %p1399_p3 = pnand %p1398_p10, %p1394_p0 }
  0x63   : > { %1402 = shalt.err (!%p1399_p3)
}
  0x64   : > { %s1403_s11 = scalar_lea.vmem %s1878_s27, 64  ;;  %s1666_s1 = smov [#allocation10]  }
  0x65   : > { %p1404_p2 = scmp.ne.s32.totalorder %s1878_s27, %s1403_s11  ;;  %s1408_s2 = sshll.u32 %s1666_s1, 4  ;;  %s1409_s2 = int_to_ptr.vmem [resolvable:$false] %s1408_s2 }
  0x66   : > { %s1410_s23 = scalar_lea.vmem %s1409_s2, 128  ;;  %p1411_p12 = scmp.lt.s32.totalorder %s1878_s27, %s1409_s2 }
  0x67   : > { %p1406_p5 = pnand %p1404_p2, %p1392_p7  ;;  %p1412_p11 = scmp.lt.s32.totalorder %s1410_s23, %s1403_s11 }
  0x69   : > { %p1407_p6 = pneg %p1406_p5  ;;  %p1413_p8 = por %p1412_p11, %p1411_p12 }
  0x6b   : > { %p1414_p4 = pnand %p1413_p8, %p1407_p6 }
  0x6d   : > { %1417 = shalt.err (!%p1414_p4)
}
  0x6e   : > { %s2427_s20 = smov 32   ;;  %s2429_s8 = smov 2  }
  0x6f   : > { %1203 = dma.hbm_to_vmem [thread:$0]  (!%p1865_p13), %s1890_s7, 64, %s1878_s27, %s1894_s6, %s2427_s20, %s2427_s20, %s2429_s8  }
  0x70   : > { %p2461_p2 = scmp.eq.s32.totalorder %s1853_s12, 0  ;;  %p2463_p3 = scmp.ne.s32.totalorder %s1640_s10, %s1636_s30 }
  0x71   : > { %p2464_p8 = scmp.eq.s32.totalorder %s1660_s15, 0  ;;  %p92_p10 = scmp.ne.s32.totalorder %s1636_s30, %s1632_s29 }
  0x72   : > { %s1923_s9 = scalar_select %p2461_p2, %s1640_s10, %s79_s17  }
  0x73   : > { %p88_p9 = por %p2464_p8, %p2463_p3  ;;  %s260_s18 = sand.u32 1, %s1640_s10  }
  0x74   : > { %2462 = sst [smem:[#allocation37_spill]] %s1923_s9  ;;  %p2465_p11 = scmp.eq.s32.totalorder %s1810_s16, 0 }
  0x75   : > { %s1132_s12 = sshll.u32 %s260_s18, 2  ;;  %p2467_p13 = scmp.lt.s32.totalorder %s1660_s15, 4 }
  0x76   : > { %p1935_p4 = por %p2465_p11, %p92_p10  ;;  %s264_s17 = scalar_lea.vmem [#allocation7], %s1132_s12 }
  0x77   : > { %p1941_p5 = pnand %p2467_p13, %p88_p9  ;;  %p2469_p7 = pmov %p2467_p13 }
  0x78   : > { %s2466_s7 = scalar_select %p1935_p4, 1, 0 }
  0x79   : > { %s1179_s27 = scalar_select %p88_p9, [#allocation3], [#allocation16] }
  0x7a   : > { %s1180_s29 = scalar_select %p88_p9, %s1656_s14, 0 }
  0x7b   : > { %s2532_s27 = smov (!%p2469_p7, %s1179_s27), [#allocation18]  ;;  %p2470_p0 = pmov %p2469_p7 }
  0x7c   : > { %s275_s0 = sshll.u32 %s264_s17, 4  ;;  %s141_s1 = sadd.s32 1, %s1616_s25  ;;  %s1950_s0 = int_to_ptr.vmem [resolvable:$true] %s275_s0 }
  0x7d   : > { %s2534_s29 = smov (!%p2470_p0, %s1180_s29), 0  ;;  %p2471_p1 = scmp.eq.s32.totalorder %s1846_s26, 0 }
  0x7e   : > { %s266_s21 = sld [smem:[%s2532_s27 + %s2534_s29]]  ;;  %p148_p6 = scmp.ne.s32.totalorder %s1616_s25, %s1612_s24 }
  0x7f   : > { %s1957_s2 = scalar_select %p2471_p1, %s1616_s25, %s141_s1  }
  0x80   : > { %p2431_p12 = scmp.ne.s32.totalorder %s1612_s24, %s1608_s3  ;;  %p234_p2 = scmp.eq.s32.totalorder %s1810_s16, 3 }
  0x81   : > { %p2472_p3 = pmov %p2464_p8  ;;  %p2474_p9 = pmov %p2465_p11 }
  0x82   : > { %s2476_s4 = sld [smem:[#allocation38_spill]]  ;;  %p1985_p11 = por %p234_p2, %p148_p6 }
  0x83   : > { %p1967_p8 = por %p148_p6, %p2472_p3  ;;  %p1976_p10 = por %p2431_p12, %p2474_p9 }
  0x84   : > { %s1134_s23 = sshll.u32 %s266_s21, 2  ;;  %s1989_s1 = scalar_lea.sflag [#allocation8], %s260_s18 }
  0x85   : > { %s272_s20 = sadd.s32 %s1134_s23, %s1851_s22  ;;  %p1420_p7 = pneg %p1941_p5 }
  0x86   : > { %s2473_s8 = scalar_select %p1967_p8, 1, 0 }
  0x87   : > { %s1135_s12 = sshll.u32 %s272_s20, 5 }
  0x88   : > { %s2475_s27 = scalar_select %p1976_p10, 1, 0 }
  0x89   : > { %s1983_s17 = scalar_lea.hbm %s2476_s4, %s1135_s12  ;;  %s1423_s12 = scalar_lea.hbm %s2476_s4, 384 }
  0x8a   : > { %s2477_s21 = scalar_select %p1985_p11, 1, 0 }
  0x8b   : > { %s1418_s20 = scalar_lea.hbm %s1983_s17, 64  ;;  %p1424_p3 = scmp.lt.s32.totalorder %s1983_s17, %s2476_s4 }
  0x8c   : > { %p1419_p13 = scmp.ne.s32.totalorder %s1983_s17, %s1418_s20  ;;  %p1425_p6 = scmp.lt.s32.totalorder %s1423_s12, %s1418_s20 }
  0x8e   : > { %p1421_p0 = pnand %p1420_p7, %p1419_p13  ;;  %p1426_p2 = por %p1425_p6, %p1424_p3 }
  0x90   : > { %p1422_p1 = pneg %p1421_p0 }
  0x92   : > { %p1427_p9 = pnand %p1426_p2, %p1422_p1 }
  0x94   : > { %1430 = shalt.err (!%p1427_p9)
}
  0x95   : > { %s1431_s18 = scalar_lea.vmem %s1950_s0, 64  ;;  %s1669_s5 = smov [#allocation7]  }
  0x96   : > { %p1432_p12 = scmp.ne.s32.totalorder %s1950_s0, %s1431_s18  ;;  %s1436_s9 = sshll.u32 %s1669_s5, 4  ;;  %s1437_s9 = int_to_ptr.vmem [resolvable:$false] %s1436_s9 }
  0x97   : > { %s1438_s11 = scalar_lea.vmem %s1437_s9, 128  ;;  %p1439_p0 = scmp.lt.s32.totalorder %s1950_s0, %s1437_s9 }
  0x98   : > { %p1434_p11 = pnand %p1432_p12, %p1420_p7  ;;  %p1440_p10 = scmp.lt.s32.totalorder %s1438_s11, %s1431_s18 }
  0x9a   : > { %p1435_p13 = pneg %p1434_p11  ;;  %p1441_p4 = por %p1440_p10, %p1439_p0 }
  0x9c   : > { %p1442_p8 = pnand %p1441_p4, %p1435_p13 }
  0x9e   : > { %1445 = shalt.err (!%p1442_p8)
}
  0x9f   : > { %s2478_s20 = smov 2   ;;  %s2479_s23 = smov 32  }
  0xa0   : > { %1198 = dma.hbm_to_vmem [thread:$0]  (!%p1941_p5), %s1983_s17, 64, %s1950_s0, %s1989_s1, %s2479_s23, %s2479_s23, %s2478_s20  }
  0xa1   : > { %s2480_s5 = sadd.s32 4294967294, %s1660_s15   ;;  %s2436_s9 = sand.u32 1, %s1616_s25  }
  0xa2   : > { %p240_p4 = scmp.eq.s32.totalorder %s2480_s5, 3  ;;  %s2018_s13 = sshll.u32 %s2436_s9, 2 }
  0xa3   : > { %s1142_s12 = sshll.u32 %s1656_s14, 2  ;;  %p2481_p12 = scmp.ne.s32.totalorder %s1612_s24, %s1608_s3 }
  0xa4   : > { %s321_s29 = sadd.s32 %s1142_s12, %s1851_s22  ;;  %s315_s18 = scalar_lea.vmem [#allocation12], %s2018_s13 }
  0xa5   : > { %p2024_p8 = por %p240_p4, %p2481_p12  ;;  %s324_s11 = sshll.u32 %s315_s18, 4  ;;  %s325_s11 = int_to_ptr.vmem [resolvable:$true] %s324_s11 }
  0xa6   : > { %s1143_s4 = sshll.u32 %s321_s29, 5  ;;  %s2483_s17 = sld [smem:[#allocation40_spill]] }
  0xa7   : > { %p2484_p5 = scmp.ne.s32.totalorder %s2473_s8, 0  ;;  %p2485_p10 = scmp.lt.s32.totalorder %s1660_s15, 4 }
  0xa8   : > { %s2487_s28 = sld [smem:[#allocation41_spill]]  ;;  %s1459_s12 = scalar_lea.vmem %s325_s11, 64 }
  0xa9   : > { %p2037_p11 = pnand %p2485_p10, %p2484_p5  ;;  %p1460_p1 = scmp.ne.s32.totalorder %s325_s11, %s1459_s12 }
  0xaa   : > { %s1670_s10 = smov [#allocation12]  }
  0xab   : > { %p1448_p7 = pneg %p2037_p11  ;;  %s1464_s8 = sshll.u32 %s1670_s10, 4  ;;  %s1465_s8 = int_to_ptr.vmem [resolvable:$false] %s1464_s8 }
  0xac   : > { %s323_s1 = scalar_lea.hbm %s2483_s17, %s1143_s4  ;;  %s1466_s29 = scalar_lea.vmem %s1465_s8, 128 }
  0xad   : > { %p1462_p3 = pnand %p1460_p1, %p1448_p7  ;;  %p1467_p2 = scmp.lt.s32.totalorder %s325_s11, %s1465_s8 }
  0xae   : > { %s2044_s22 = scalar_lea.hbm %s2487_s28, %s1143_s4  ;;  %p1468_p9 = scmp.lt.s32.totalorder %s1466_s29, %s1459_s12 }
  0xaf   : > { %p1463_p6 = pneg %p1462_p3 }
  0xb0   : > { %p1469_p13 = por %p1468_p9, %p1467_p2 }
  0xb2   : > { %p1470_p0 = pnand %p1469_p13, %p1463_p6 }
  0xb4   : > { %1473 = shalt.err (!%p1470_p0)
}
  0xb5   : > { %1206 = dma.hbm_to_vmem [thread:$0]  (!%p2037_p11), %s323_s1, 64, %s325_s11, %s1894_s6, %s2479_s23, %s2479_s23, %s2478_s20  }
  0xb6   : > { %s338_s4 = scalar_lea.vmem [#allocation13], %s2018_s13  ;;  %s2488_s14 = sand.u32 1, %s1616_s25  }
  0xb7   : > { %s347_s28 = sshll.u32 %s338_s4, 4  ;;  %s335_s9 = scalar_lea.sflag [#allocation14], %s2488_s14  ;;  %s348_s28 = int_to_ptr.vmem [resolvable:$true] %s347_s28 }
  0xb8   : > { %s1487_s18 = scalar_lea.vmem %s348_s28, 64  ;;  %s1671_s0 = smov [#allocation13]  }
  0xb9   : > { %p1488_p4 = scmp.ne.s32.totalorder %s348_s28, %s1487_s18  ;;  %s1492_s17 = sshll.u32 %s1671_s0, 4  ;;  %s1493_s17 = int_to_ptr.vmem [resolvable:$false] %s1492_s17 }
  0xba   : > { %s1494_s12 = scalar_lea.vmem %s1493_s17, 128  ;;  %p1495_p10 = scmp.lt.s32.totalorder %s348_s28, %s1493_s17 }
  0xbb   : > { %p1490_p12 = pnand %p1488_p4, %p1448_p7  ;;  %p1496_p1 = scmp.lt.s32.totalorder %s1494_s12, %s1487_s18 }
  0xbd   : > { %p1491_p5 = pneg %p1490_p12  ;;  %p1497_p3 = por %p1496_p1, %p1495_p10 }
  0xbf   : > { %p1498_p6 = pnand %p1497_p3, %p1491_p5 }
  0xc1   : > { %1501 = shalt.err (!%p1498_p6)
}
  0xc2   : > { %1209 = dma.hbm_to_vmem [thread:$0]  (!%p2037_p11), %s2044_s22, 64, %s348_s28, %s335_s9, %s2479_s23, %s2479_s23, %s2478_s20  }
  0xc3   : > { %p2489_p2 = scmp.ne.s32.totalorder %s2459_s19, 0 }
  0xc4   : > { %s368_s6 = sand.u32 (!%p2489_p2), 1, %s1636_s30   ;;  %p2490_p7 = scmp.ne.s32.totalorder (!%p2489_p2), %s2466_s7, 0 }
  0xc5   : > { %366 = sbr.rel (%p2489_p2) target bundleno = 1631 (0x65f), region = 40  ;;  %s2072_s13 = sshll.u32 (!%p2489_p2), %s368_s6, 2 }
  0xc6   : > { %s369_s11 = scalar_lea.sflag (!%p2489_p2), [#allocation8], %s368_s6  ;;  %s372_s1 = scalar_lea.vmem (!%p2489_p2), [#allocation7], %s2072_s13 }
  0xca   : > { %1587 = dma.done.wait (%p2490_p7), %s369_s11, 64  }
  0xcb   : > { %1589 = vsyncadd (%p2490_p7), %s369_s11, 4294967232  ;;  %s2491_s5 = sld [smem:[#allocation26_spill]]  ;;  %s377_s20 = sand.u32 1, %s1810_s16  }
  0xcc   : > { %s2492_s10 = sld [smem:[#allocation35_spill]]  ;;  %s378_s22 = scalar_lea.sflag [#allocation11], %s377_s20 }
  0xd1   : > { %s379_s23 = sand.u32 1, %s2491_s5  }
  0xd2   : > { %s2081_s19 = sshll.u32 %s379_s23, 2  ;;  %p2493_p11 = scmp.ne.s32.totalorder %s2492_s10, 0 }
  0xd3   : > { %s381_s8 = scalar_lea.vmem [#allocation10], %s2081_s19 }
  0xd4   : > { %1591 = dma.done.wait (%p2493_p11), %s378_s22, 64  }
  0xd5   : > { %1593 = vsyncadd (%p2493_p11), %s378_s22, 4294967232  ;;  %s2089_s29 = sand.u32 1, %s1612_s24   ;;  %p2494_p9 = scmp.ne.s32.totalorder %s2475_s27, 0 }
  0xd6   : > { %s2092_s7 = sshll.u32 %s2089_s29, 2 }
  0xd7   : > { %s390_s16 = scalar_lea.vmem [#allocation12], %s2092_s7 }
  0xd8   : > { %1595 = dma.done.wait (%p2494_p9), %s378_s22, 64  }
  0xd9   : > { %1597 = vsyncadd (%p2494_p9), %s378_s22, 4294967232  ;;  %s396_s4 = scalar_lea.sflag [#allocation14], %s2089_s29  ;;  %s399_s28 = scalar_lea.vmem [#allocation13], %s2092_s7 }
  0xda   : > { %1599 = dma.done.wait (%p2494_p9), %s396_s4, 64  }
  0xdb   : > { %1601 = vsyncadd (%p2494_p9), %s396_s4, 4294967232  ;;  %s2495_s14 = sld [smem:[#allocation30_spill]]  ;;  %v2113_v0 = vld [vmem:[%s390_s16] sm:$0x3]  ;;  %v2115_v1 = vld [vmem:[%s390_s16 + $0x2] sm:$0x3] }
  0xdc   : > { %s2496_s12 = sld [smem:[#allocation42_spill]]  ;;  %s2118_s11 = scalar_lea.vmem [#allocation15], %s2092_s7 }
  0xdd   : > { %461 = vst [vmem:[%s2118_s11] sm:$0x3] %v2113_v0  ;;  %462 = vst [vmem:[%s2118_s11 + $0x2] sm:$0x3] %v2115_v1 }
  0xe1   : > { %p454_p13 = scmp.lt.s32.totalorder %s2495_s14, 1  ;;  %s464_s9 = sld [smem:[#allocation6 + %s2495_s14]] }
  0xe3   : > { %s2536_s14 = smov (!%p454_p13, %s2495_s14), 1 }
  0xe4   : > { %s1154_s18 = sshll.u32 %s2536_s14, 1 }
  0xe5   : > { %s2111_s6 = scalar_lea.vmem %s2496_s12, %s1154_s18 }
  0xe7   : > { %p1155_p0 = scmp.le.s32.totalorder %s464_s9, 0 }
  0xe8   : > { %s2497_s27 = sld [smem:[#allocation30_spill]] (!%p1155_p0) }
  0xe9   : > { %468 = sbr.rel (%p1155_p0) target bundleno = 910 (0x38e), region = 60 }
  0xee   : > { %v472_v2 = vld [vmem:[%s372_s1] sm:$0x3]  ;;  %vm477_vm0 = vcmask 1041408   ;;  %v473_v3 = vld [vmem:[%s372_s1 + $0x2] sm:$0x3]  ;;  %v1672_v47 = vmov 0.0  }
  0xef   : > { %v474_v4 = vsub.f32 %v472_v2, %v2113_v0  ;;  %v475_v5 = vsub.f32 %v473_v3, %v2115_v1  ;;  %s2183_s13 = sld [smem:[#allocation5 + %s2497_s27]] }
  0xf0   : > { %s2186_s1 = sld [smem:[#allocation4 + %s2497_s27]] }
  0xf1   : > { %v478_v6 = vsel %vm477_vm0, %v474_v4, 0.0  ;;  %v481_v7 = vsel %vm477_vm0, %v475_v5, 0.0 }
  0xf2   : > { %479 = vadd.xlane.f32.xlu0 %v478_v6 }
  0xf5   : > { %s665_s5 = sand.u32 2147483647, %s2183_s13 }
  0xf6   : > { %482 = vadd.xlane.f32.xlu0 %v481_v7  ;;  %s669_s10 = sand.u32 2147483647, %s2186_s1 }
 0x17b   : > { %v480_v8 = vpop.xlane.xlu0 %479 }
 0x17c   : > { %v484_v9 = vsel %vm477_vm0, %v480_v8, 0.0 }
 0x17d   : > { %v485_v10 = vrot.slane %v484_v9, 4 }
 0x17f   : > { %v486_v11 = vadd.f32 %v485_v10, %v484_v9  ;;  %v483_v12 = vpop.xlane.xlu0 %482 }
 0x180   : > { %v491_v13 = vsel %vm477_vm0, %v483_v12, 0.0 }
 0x181   : > { %v487_v14 = vrot.slane %v486_v11, 2  ;;  %v492_v15 = vrot.slane %v491_v13, 4 }
 0x183   : > { %v488_v16 = vadd.f32 %v487_v14, %v486_v11  ;;  %v493_v17 = vadd.f32 %v492_v15, %v491_v13 }
 0x185   : > { %v489_v18 = vrot.slane %v488_v16, 1  ;;  %v494_v19 = vrot.slane %v493_v17, 2 }
 0x187   : > { %v490_v20 = vadd.f32 %v489_v18, %v488_v16  ;;  %v495_v21 = vadd.f32 %v494_v19, %v493_v17 }
 0x189   : > { %v2134_v22 = vmul.f32 0.00390625, %v490_v20  ;;  %v496_v23 = vrot.slane %v495_v21, 1 }
 0x18b   : > { %v497_v24 = vadd.f32 %v496_v23, %v495_v21  ;;  %v2137_v25 = vsub.f32 %v474_v4, %v2134_v22 }
 0x18d   : > { %v2139_v26 = vmul.f32 0.00390625, %v497_v24  ;;  %v502_v27 = vand.u32 2147483647, %v2137_v25 }
 0x18f   : > { %v504_v28 = vsel %vm477_vm0, %v502_v27, -inf  ;;  %v2144_v29 = vsub.f32 %v475_v5, %v2139_v26 }
 0x190   : > { %505 = vmax.xlane.f32.xlu1 %v504_v28 }
 0x191   : > { %v503_v30 = vand.u32 2147483647, %v2144_v29 }
 0x193   : > { %v507_v31 = vsel %vm477_vm0, %v503_v30, -inf }
 0x194   : > { %508 = vmax.xlane.f32.xlu1 %v507_v31 }
 0x219   : > { %v506_v32 = vpop.xlane.xlu1 %505 }
 0x21a   : > { %v510_v33 = vsel %vm477_vm0, %v506_v32, -inf }
 0x21b   : > { %v511_v34 = vrot.slane %v510_v33, 4 }
 0x21d   : > { %v512_v35 = vmax.f32 %v510_v33, %v511_v34  ;;  %v509_v36 = vpop.xlane.xlu1 %508 }
 0x21e   : > { %v517_v37 = vsel %vm477_vm0, %v509_v36, -inf }
 0x21f   : > { %v513_v38 = vrot.slane %v512_v35, 2  ;;  %v518_v39 = vrot.slane %v517_v37, 4 }
 0x221   : > { %v514_v40 = vmax.f32 %v512_v35, %v513_v38  ;;  %v519_v41 = vmax.f32 %v517_v37, %v518_v39 }
 0x223   : > { %v515_v42 = vrot.slane %v514_v40, 1  ;;  %v520_v43 = vrot.slane %v519_v41, 2 }
 0x225   : > { %v2150_v44 = vmax.f32 %v514_v40, %v515_v42  ;;  %v521_v45 = vmax.f32 %v519_v41, %v520_v43 }
 0x227   : > { %v522_v46 = vrot.slane %v521_v45, 1  ;;  %vm524_vm1 = vcmp.eq.f32.partialorder %v502_v27, %v2150_v44 }
 0x228   : > { %v1156_v48 = vsel %vm524_vm1, 1.0, %v1672_v47 }
 0x229   : > { %v2154_v49 = vmax.f32 %v521_v45, %v522_v46  ;;  %v583_v50 = vsub.f32 1.0, %v1156_v48  ;;  %v530_v56 = vsel %vm477_vm0, %v1156_v48, 0.0 }
 0x22b   : > { %v585_v51 = vmul.f32 %v583_v50, %v502_v27  ;;  %vm525_vm2 = vcmp.eq.f32.partialorder %v503_v30, %v2154_v49 }
 0x22c   : > { %v1157_v52 = vsel %vm525_vm2, 1.0, %v1672_v47 }
 0x22d   : > { %v587_v53 = vsel %vm477_vm0, %v585_v51, -inf  ;;  %v584_v54 = vsub.f32 1.0, %v1157_v52  ;;  %v533_v58 = vsel %vm477_vm0, %v1157_v52, 0.0 }
 0x22e   : > { %588 = vmax.xlane.f32.xlu0 %v587_v53 }
 0x22f   : > { %v586_v55 = vmul.f32 %v584_v54, %v503_v30 }
 0x231   : > { %v590_v57 = vsel %vm477_vm0, %v586_v55, -inf }
 0x232   : > { %531 = vadd.xlane.f32.xlu0 %v530_v56  ;;  %591 = vmax.xlane.f32.xlu1 %v590_v57 }
 0x236   : > { %534 = vadd.xlane.f32.xlu1 %v533_v58 }
 0x2b7   : > { %v589_v59 = vpop.xlane.xlu0 %588 }
 0x2b8   : > { %v593_v60 = vsel %vm477_vm0, %v589_v59, -inf }
 0x2b9   : > { %v594_v61 = vrot.slane %v593_v60, 4 }
 0x2bb   : > { %v595_v62 = vmax.f32 %v593_v60, %v594_v61  ;;  %v592_v63 = vpop.xlane.xlu1 %591  ;;  %v532_v17 = vpop.xlane.xlu0 %531 }
 0x2bc   : > { %v600_v2 = vsel %vm477_vm0, %v592_v63, -inf  ;;  %v536_v18 = vsel %vm477_vm0, %v532_v17, 0.0 }
 0x2bd   : > { %v596_v3 = vrot.slane %v595_v62, 2  ;;  %v601_v4 = vrot.slane %v600_v2, 4  ;;  %v537_v20 = vrot.slane %v536_v18, 4 }
 0x2bf   : > { %v597_v5 = vmax.f32 %v595_v62, %v596_v3  ;;  %v602_v6 = vmax.f32 %v600_v2, %v601_v4  ;;  %v535_v19 = vpop.xlane.xlu1 %534  ;;  %v538_v23 = vadd.f32 %v537_v20, %v536_v18 }
 0x2c0   : > { %v543_v21 = vsel %vm477_vm0, %v535_v19, 0.0 }
 0x2c1   : > { %v598_v7 = vrot.slane %v597_v5, 1  ;;  %v603_v8 = vrot.slane %v602_v6, 2  ;;  %v544_v24 = vrot.slane %v543_v21, 4  ;;  %v539_v27 = vrot.slane %v538_v23, 2 }
 0x2c3   : > { %v2164_v9 = vmax.f32 %v597_v5, %v598_v7  ;;  %v604_v10 = vmax.f32 %v602_v6, %v603_v8  ;;  %v545_v28 = vadd.f32 %v544_v24, %v543_v21  ;;  %v540_v30 = vadd.f32 %v539_v27, %v538_v23 }
 0x2c5   : > { %v605_v11 = vrot.slane %v604_v10, 1  ;;  %vm607_vm3 = vcmp.eq.f32.partialorder %v585_v51, %v2164_v9  ;;  %v546_v31 = vrot.slane %v545_v28, 2  ;;  %v541_v32 = vrot.slane %v540_v30, 1 }
 0x2c6   : > { %v1162_v12 = vsel %vm607_vm3, 1.0, %v1672_v47 }
 0x2c7   : > { %v2168_v13 = vmax.f32 %v604_v10, %v605_v11  ;;  %v613_v14 = vsel %vm477_vm0, %v1162_v12, 0.0  ;;  %v547_v33 = vadd.f32 %v546_v31, %v545_v28  ;;  %v542_v37 = vadd.f32 %v541_v32, %v540_v30 }
 0x2c8   : > { %614 = vadd.xlane.f32.xlu0 %v613_v14  ;;  %v670_v12 = vstv %s669_s10  ;;  %v683_v31 = vstv %s2186_s1 }
 0x2c9   : > { %vm608_vm4 = vcmp.eq.f32.partialorder %v586_v55, %v2168_v13  ;;  %v548_v38 = vrot.slane %v547_v33, 1  ;;  %vm553_vm5 = vcmp.gt.f32.partialorder %v542_v37, 1.0  ;;  %vm558_vm6 = vcmp.gt.f32.partialorder %v542_v37, 0.0 }
 0x2ca   : > { %v1163_v15 = vsel %vm608_vm4, 1.0, %v1672_v47  ;;  %v1158_v52 = vsel %vm553_vm5, 1.0, %v1672_v47  ;;  %v1160_v53 = vsel %vm558_vm6, 1.0, %v1672_v47  ;;  %vm635_vm9 = vcmp.le.f32.partialorder %v542_v37, 1.0 }
 0x2cb   : > { %v616_v16 = vsel %vm477_vm0, %v1163_v15, 0.0  ;;  %v549_v45 = vadd.f32 %v548_v38, %v547_v33  ;;  %v575_v56 = vmax.f32 %v1158_v52, 0.0  ;;  %v581_v59 = vmax.f32 %v1160_v53, 0.0 }
 0x2cc   : > { %617 = vadd.xlane.f32.xlu1 %v616_v16  ;;  %vm641_vm12 = vcmp.le.f32.partialorder %v542_v37, 0.0  ;;  %v567_v3 = vsel %vm553_vm5, %v2150_v44, 0.0  ;;  %v569_v4 = vsel %vm558_vm6, %v2150_v44, 0.0 }
 0x2cd   : > { %vm554_vm7 = vcmp.gt.f32.partialorder %v549_v45, 1.0  ;;  %vm559_vm8 = vcmp.gt.f32.partialorder %v549_v45, 0.0  ;;  %vm647_vm14 = vcmp.lt.f32.partialorder %v575_v56, 0.5  ;;  %vm636_vm3 = vcmp.le.f32.partialorder %v549_v45, 1.0 }
 0x2ce   : > { %v1159_v60 = vsel %vm554_vm7, 1.0, %v1672_v47  ;;  %v1161_v61 = vsel %vm559_vm8, 1.0, %v1672_v47  ;;  %v568_v44 = vsel %vm554_vm7, %v2154_v49, 0.0  ;;  %v570_v10 = vsel %vm559_vm8, %v2154_v49, 0.0 }
 0x2cf   : > { %v576_v63 = vmax.f32 %v1159_v60, 0.0  ;;  %v582_v5 = vmax.f32 %v1161_v61, 0.0 }
 0x2d1   : > { %vm648_vm5 = vcmp.lt.f32.partialorder %v576_v63, 0.5  ;;  %vm652_vm6 = vcmp.lt.f32.partialorder %v582_v5, 0.5 }
 0x351   : > { %v615_v34 = vpop.xlane.xlu0 %614 }
 0x352   : > { %v619_v35 = vsel %vm477_vm0, %v615_v34, 0.0  ;;  %v469_v34 = vld [vmem:[%s2118_s11] sm:$0x3] }
 0x353   : > { %v620_v36 = vrot.slane %v619_v35, 4 }
 0x355   : > { %v621_v39 = vadd.f32 %v620_v36, %v619_v35  ;;  %v618_v40 = vpop.xlane.xlu1 %617 }
 0x356   : > { %v626_v41 = vsel %vm477_vm0, %v618_v40, 0.0  ;;  %vm651_vm0 = vcmp.lt.f32.partialorder %v581_v59, 0.5 }
 0x357   : > { %v622_v42 = vrot.slane %v621_v39, 2  ;;  %v627_v43 = vrot.slane %v626_v41, 4 }
 0x359   : > { %v623_v46 = vadd.f32 %v622_v42, %v621_v39  ;;  %v628_v48 = vadd.f32 %v627_v43, %v626_v41  ;;  %v470_v39 = vld [vmem:[%s2118_s11 + $0x2] sm:$0x3] }
 0x35b   : > { %v624_v50 = vrot.slane %v623_v46, 1  ;;  %v629_v51 = vrot.slane %v628_v48, 2 }
 0x35d   : > { %v625_v54 = vadd.f32 %v624_v50, %v623_v46  ;;  %v630_v55 = vadd.f32 %v629_v51, %v628_v48 }
 0x35f   : > { %v633_v57 = vadd.f32 %v625_v54, %v542_v37  ;;  %v631_v58 = vrot.slane %v630_v55, 1 }
 0x361   : > { %vm637_vm10 = vcmp.gt.f32.partialorder %v633_v57, 1.0  ;;  %vm643_vm11 = vcmp.gt.f32.partialorder %v633_v57, 0.0  ;;  %v632_v62 = vadd.f32 %v631_v58, %v630_v55 }
 0x362   : > { %vm639_vm13 = vmand %vm635_vm9, %vm637_vm10  ;;  %vm642_vm10 = vcmp.le.f32.partialorder %v549_v45, 0.0 }
 0x363   : > { %vm645_vm15 = vmand %vm641_vm12, %vm643_vm11  ;;  %v634_v2 = vadd.f32 %v632_v62, %v549_v45 }
 0x364   : > { %vm649_vm1 = vmand %vm647_vm14, %vm639_vm13 }
 0x365   : > { %vm653_vm2 = vmand %vm651_vm0, %vm645_vm15  ;;  %v655_v47 = vsel %vm649_vm1, %v2164_v9, %v567_v3  ;;  %vm638_vm4 = vcmp.gt.f32.partialorder %v634_v2, 1.0  ;;  %vm644_vm9 = vcmp.gt.f32.partialorder %v634_v2, 0.0 }
 0x366   : > { %v657_v6 = vsel %vm653_vm2, %v2164_v9, %v569_v4  ;;  %vm640_vm11 = vmand %vm636_vm3, %vm638_vm4  ;;  %v666_v9 = vstv %s665_s5 }
 0x367   : > { %v659_v7 = vsub.f32 %v657_v6, %v655_v47  ;;  %vm646_vm12 = vmand %vm642_vm10, %vm644_vm9 }
 0x368   : > { %vm650_vm13 = vmand %vm648_vm5, %vm640_vm11 }
 0x369   : > { %v661_v8 = vmul.f32 0.8725, %v659_v7  ;;  %vm654_vm14 = vmand %vm652_vm6, %vm646_vm12  ;;  %v656_v11 = vsel %vm650_vm13, %v2168_v13, %v568_v44 }
 0x36a   : > { %v658_v14 = vsel %vm654_vm14, %v2168_v13, %v570_v10 }
 0x36b   : > { %v663_v15 = vadd.f32 %v661_v8, %v655_v47  ;;  %v660_v16 = vsub.f32 %v658_v14, %v656_v11 }
 0x36d   : > { %v667_v17 = vmul.f32 %v666_v9, %v663_v15  ;;  %v671_v18 = vmul.f32 %v670_v12, %v663_v15  ;;  %v662_v19 = vmul.f32 0.8725, %v660_v16 }
 0x36f   : > { %v673_v20 = vmax.f32 %v671_v18, %v667_v17  ;;  %v664_v21 = vadd.f32 %v662_v19, %v656_v11 }
 0x371   : > { %1338 = vrcp.f32 %v673_v20  ;;  %v668_v23 = vmul.f32 %v666_v9, %v664_v21  ;;  %v672_v49 = vmul.f32 %v670_v12, %v664_v21 }
 0x373   : > { %v674_v24 = vmax.f32 %v672_v49, %v668_v23 }
 0x375   : > { %1340 = vrcp.f32 %v674_v24 }
 0x37e   : > { %v1339_v27 = vpop.eup %1338 }
 0x37f   : > { %v676_v28 = vmul.f32 %v1339_v27, %v667_v17 }
 0x381   : > { %v679_v13 = vmul.f32 %v676_v28, %v2137_v25 }
 0x382   : > { %v1341_v30 = vpop.eup %1340 }
 0x383   : > { %v681_v32 = vadd.f32 %v679_v13, %v2134_v22  ;;  %v678_v33 = vmul.f32 %v1341_v30, %v668_v23 }
 0x385   : > { %v684_v35 = vmul.f32 %v683_v31, %v681_v32  ;;  %v680_v36 = vmul.f32 %v678_v33, %v2144_v29 }
 0x387   : > { %v686_v37 = vadd.f32 %v684_v35, %v469_v34  ;;  %v682_v38 = vadd.f32 %v680_v36, %v2139_v26 }
 0x389   : > { %688 = vst [vmem:[%s2118_s11] sm:$0x3] %v686_v37  ;;  %v685_v40 = vmul.f32 %v683_v31, %v682_v38 }
 0x38b   : > { %v687_v41 = vadd.f32 %v685_v40, %v470_v39 }
 0x38d   : > { %689 = vst [vmem:[%s2118_s11 + $0x2] sm:$0x3] %v687_v41 }
 0x38e PF: > { %s2498_s20 = sld [smem:[#allocation30_spill]] }
 0x394   : > { %s2216_s23 = sadd.s32 2, %s2498_s20 }
 0x395   : > { %s692_s22 = sld [smem:[#allocation6 + %s2216_s23]] }
 0x39b   : > { %p1164_p4 = scmp.le.s32.totalorder %s692_s22, 0 }
 0x39c   : > { %s2278_s19 = sld [smem:[#allocation5 + %s2216_s23]] (!%p1164_p4) }
 0x39d   : > { %696 = sbr.rel (%p1164_p4) target bundleno = 1602 (0x642), region = 64 }
 0x3a2   : > { %v700_v22 = vld [vmem:[%s381_s8] sm:$0x3]  ;;  %vm705_vm7 = vcmask 1041408   ;;  %v701_v25 = vld [vmem:[%s381_s8 + $0x2] sm:$0x3]  ;;  %v1673_v21 = vmov 0.0  }
 0x3a3   : > { %v702_v26 = vsub.f32 %v700_v22, %v2113_v0  ;;  %v703_v29 = vsub.f32 %v701_v25, %v2115_v1  ;;  %s2281_s8 = sld [smem:[#allocation4 + %s2216_s23]]  ;;  %s893_s16 = sand.u32 2147483647, %s2278_s19 }
 0x3a5   : > { %v706_v42 = vsel %vm705_vm7, %v702_v26, 0.0  ;;  %v709_v43 = vsel %vm705_vm7, %v703_v29, 0.0 }
 0x3a6   : > { %707 = vadd.xlane.f32.xlu0 %v706_v42 }
 0x3a9   : > { %s897_s4 = sand.u32 2147483647, %s2281_s8 }
 0x3aa   : > { %710 = vadd.xlane.f32.xlu0 %v709_v43 }
 0x42f   : > { %v708_v45 = vpop.xlane.xlu0 %707 }
 0x430   : > { %v712_v46 = vsel %vm705_vm7, %v708_v45, 0.0 }
 0x431   : > { %v713_v48 = vrot.slane %v712_v46, 4 }
 0x433   : > { %v714_v50 = vadd.f32 %v713_v48, %v712_v46  ;;  %v711_v51 = vpop.xlane.xlu0 %710 }
 0x434   : > { %v719_v52 = vsel %vm705_vm7, %v711_v51, 0.0 }
 0x435   : > { %v715_v53 = vrot.slane %v714_v50, 2  ;;  %v720_v54 = vrot.slane %v719_v52, 4 }
 0x437   : > { %v716_v55 = vadd.f32 %v715_v53, %v714_v50  ;;  %v721_v0 = vadd.f32 %v720_v54, %v719_v52 }
 0x439   : > { %v717_v56 = vrot.slane %v716_v55, 1  ;;  %v722_v1 = vrot.slane %v721_v0, 2 }
 0x43b   : > { %v718_v57 = vadd.f32 %v717_v56, %v716_v55  ;;  %v723_v58 = vadd.f32 %v722_v1, %v721_v0 }
 0x43d   : > { %v2229_v59 = vmul.f32 0.00390625, %v718_v57  ;;  %v724_v60 = vrot.slane %v723_v58, 1 }
 0x43f   : > { %v725_v61 = vadd.f32 %v724_v60, %v723_v58  ;;  %v2232_v62 = vsub.f32 %v702_v26, %v2229_v59 }
 0x441   : > { %v2234_v63 = vmul.f32 0.00390625, %v725_v61  ;;  %v730_v2 = vand.u32 2147483647, %v2232_v62 }
 0x443   : > { %v732_v3 = vsel %vm705_vm7, %v730_v2, -inf  ;;  %v2239_v4 = vsub.f32 %v703_v29, %v2234_v63 }
 0x444   : > { %733 = vmax.xlane.f32.xlu1 %v732_v3 }
 0x445   : > { %v731_v5 = vand.u32 2147483647, %v2239_v4 }
 0x447   : > { %v735_v47 = vsel %vm705_vm7, %v731_v5, -inf }
 0x448   : > { %736 = vmax.xlane.f32.xlu1 %v735_v47 }
 0x4cd   : > { %v734_v6 = vpop.xlane.xlu1 %733 }
 0x4ce   : > { %v738_v7 = vsel %vm705_vm7, %v734_v6, -inf }
 0x4cf   : > { %v739_v44 = vrot.slane %v738_v7, 4 }
 0x4d1   : > { %v740_v8 = vmax.f32 %v738_v7, %v739_v44  ;;  %v737_v10 = vpop.xlane.xlu1 %736 }
 0x4d2   : > { %v745_v11 = vsel %vm705_vm7, %v737_v10, -inf }
 0x4d3   : > { %v741_v9 = vrot.slane %v740_v8, 2  ;;  %v746_v12 = vrot.slane %v745_v11, 4 }
 0x4d5   : > { %v742_v14 = vmax.f32 %v740_v8, %v741_v9  ;;  %v747_v15 = vmax.f32 %v745_v11, %v746_v12 }
 0x4d7   : > { %v743_v16 = vrot.slane %v742_v14, 1  ;;  %v748_v17 = vrot.slane %v747_v15, 2 }
 0x4d9   : > { %v2245_v18 = vmax.f32 %v742_v14, %v743_v16  ;;  %v749_v19 = vmax.f32 %v747_v15, %v748_v17 }
 0x4db   : > { %v750_v20 = vrot.slane %v749_v19, 1  ;;  %vm752_vm8 = vcmp.eq.f32.partialorder %v730_v2, %v2245_v18 }
 0x4dc   : > { %v1165_v23 = vsel %vm752_vm8, 1.0, %v1673_v21 }
 0x4dd   : > { %v2249_v49 = vmax.f32 %v749_v19, %v750_v20  ;;  %v811_v24 = vsub.f32 1.0, %v1165_v23  ;;  %v758_v32 = vsel %vm705_vm7, %v1165_v23, 0.0 }
 0x4df   : > { %v813_v27 = vmul.f32 %v811_v24, %v730_v2  ;;  %vm753_vm15 = vcmp.eq.f32.partialorder %v731_v5, %v2249_v49 }
 0x4e0   : > { %v1166_v28 = vsel %vm753_vm15, 1.0, %v1673_v21 }
 0x4e1   : > { %v815_v13 = vsel %vm705_vm7, %v813_v27, -inf  ;;  %v812_v30 = vsub.f32 1.0, %v1166_v28  ;;  %v761_v34 = vsel %vm705_vm7, %v1166_v28, 0.0 }
 0x4e2   : > { %816 = vmax.xlane.f32.xlu0 %v815_v13 }
 0x4e3   : > { %v814_v31 = vmul.f32 %v812_v30, %v731_v5 }
 0x4e5   : > { %v818_v33 = vsel %vm705_vm7, %v814_v31, -inf }
 0x4e6   : > { %759 = vadd.xlane.f32.xlu0 %v758_v32  ;;  %819 = vmax.xlane.f32.xlu1 %v818_v33 }
 0x4ea   : > { %762 = vadd.xlane.f32.xlu1 %v761_v34 }
 0x56b   : > { %v817_v35 = vpop.xlane.xlu0 %816 }
 0x56c   : > { %v821_v36 = vsel %vm705_vm7, %v817_v35, -inf }
 0x56d   : > { %v822_v37 = vrot.slane %v821_v36, 4 }
 0x56f   : > { %v823_v38 = vmax.f32 %v821_v36, %v822_v37  ;;  %v820_v39 = vpop.xlane.xlu1 %819  ;;  %v760_v54 = vpop.xlane.xlu0 %759 }
 0x570   : > { %v828_v40 = vsel %vm705_vm7, %v820_v39, -inf  ;;  %v764_v55 = vsel %vm705_vm7, %v760_v54, 0.0 }
 0x571   : > { %v824_v41 = vrot.slane %v823_v38, 2  ;;  %v829_v22 = vrot.slane %v828_v40, 4  ;;  %v765_v56 = vrot.slane %v764_v55, 4 }
 0x573   : > { %v825_v25 = vmax.f32 %v823_v38, %v824_v41  ;;  %v830_v26 = vmax.f32 %v828_v40, %v829_v22  ;;  %v763_v0 = vpop.xlane.xlu1 %762  ;;  %v766_v57 = vadd.f32 %v765_v56, %v764_v55 }
 0x574   : > { %v771_v1 = vsel %vm705_vm7, %v763_v0, 0.0 }
 0x575   : > { %v826_v29 = vrot.slane %v825_v25, 1  ;;  %v831_v42 = vrot.slane %v830_v26, 2  ;;  %v772_v58 = vrot.slane %v771_v1, 4  ;;  %v767_v60 = vrot.slane %v766_v57, 2 }
 0x577   : > { %v2259_v43 = vmax.f32 %v825_v25, %v826_v29  ;;  %v832_v45 = vmax.f32 %v830_v26, %v831_v42  ;;  %v773_v61 = vadd.f32 %v772_v58, %v771_v1  ;;  %v768_v2 = vadd.f32 %v767_v60, %v766_v57 }
 0x579   : > { %v833_v46 = vrot.slane %v832_v45, 1  ;;  %vm835_vm0 = vcmp.eq.f32.partialorder %v813_v27, %v2259_v43  ;;  %v774_v3 = vrot.slane %v773_v61, 2  ;;  %v769_v5 = vrot.slane %v768_v2, 1 }
 0x57a   : > { %v1171_v48 = vsel %vm835_vm0, 1.0, %v1673_v21 }
 0x57b   : > { %v2263_v50 = vmax.f32 %v832_v45, %v833_v46  ;;  %v841_v51 = vsel %vm705_vm7, %v1171_v48, 0.0  ;;  %v775_v47 = vadd.f32 %v774_v3, %v773_v61  ;;  %v770_v8 = vadd.f32 %v769_v5, %v768_v2  ;;  %v697_v5 = vld [vmem:[%s2118_s11] sm:$0x3] }
 0x57c   : > { %842 = vadd.xlane.f32.xlu0 %v841_v51  ;;  %v898_v45 = vstv %s897_s4  ;;  %v911_v61 = vstv %s2281_s8 }
 0x57d   : > { %vm836_vm1 = vcmp.eq.f32.partialorder %v814_v31, %v2263_v50  ;;  %v776_v10 = vrot.slane %v775_v47, 1  ;;  %vm781_vm2 = vcmp.gt.f32.partialorder %v770_v8, 1.0  ;;  %vm786_vm3 = vcmp.gt.f32.partialorder %v770_v8, 0.0 }
 0x57e   : > { %v1172_v52 = vsel %vm836_vm1, 1.0, %v1673_v21  ;;  %v1167_v24 = vsel %vm781_vm2, 1.0, %v1673_v21  ;;  %v1169_v27 = vsel %vm786_vm3, 1.0, %v1673_v21  ;;  %vm863_vm10 = vcmp.le.f32.partialorder %v770_v8, 1.0 }
 0x57f   : > { %v844_v53 = vsel %vm705_vm7, %v1172_v52, 0.0  ;;  %v777_v16 = vadd.f32 %v776_v10, %v775_v47  ;;  %v803_v30 = vmax.f32 %v1167_v24, 0.0  ;;  %v809_v33 = vmax.f32 %v1169_v27, 0.0 }
 0x580   : > { %845 = vadd.xlane.f32.xlu1 %v844_v53  ;;  %vm869_vm12 = vcmp.le.f32.partialorder %v770_v8, 0.0  ;;  %v795_v39 = vsel %vm781_vm2, %v2245_v18, 0.0  ;;  %v797_v40 = vsel %vm786_vm3, %v2245_v18, 0.0 }
 0x581   : > { %vm782_vm4 = vcmp.gt.f32.partialorder %v777_v16, 1.0  ;;  %vm787_vm9 = vcmp.gt.f32.partialorder %v777_v16, 0.0  ;;  %vm875_vm13 = vcmp.lt.f32.partialorder %v803_v30, 0.5  ;;  %vm864_vm0 = vcmp.le.f32.partialorder %v777_v16, 1.0 }
 0x582   : > { %v1168_v34 = vsel %vm782_vm4, 1.0, %v1673_v21  ;;  %v1170_v35 = vsel %vm787_vm9, 1.0, %v1673_v21  ;;  %v796_v18 = vsel %vm782_vm4, %v2249_v49, 0.0  ;;  %v798_v29 = vsel %vm787_vm9, %v2249_v49, 0.0 }
 0x583   : > { %v804_v37 = vmax.f32 %v1168_v34, 0.0  ;;  %v810_v41 = vmax.f32 %v1170_v35, 0.0 }
 0x585   : > { %vm876_vm2 = vcmp.lt.f32.partialorder %v804_v37, 0.5  ;;  %vm880_vm3 = vcmp.lt.f32.partialorder %v810_v41, 0.5 }
 0x605   : > { %v843_v6 = vpop.xlane.xlu0 %842 }
 0x606   : > { %v847_v7 = vsel %vm705_vm7, %v843_v6, 0.0 }
 0x607   : > { %v848_v44 = vrot.slane %v847_v7, 4 }
 0x609   : > { %v849_v11 = vadd.f32 %v848_v44, %v847_v7  ;;  %v846_v9 = vpop.xlane.xlu1 %845 }
 0x60a   : > { %v854_v12 = vsel %vm705_vm7, %v846_v9, 0.0  ;;  %vm879_vm7 = vcmp.lt.f32.partialorder %v809_v33, 0.5 }
 0x60b   : > { %v850_v14 = vrot.slane %v849_v11, 2  ;;  %v855_v15 = vrot.slane %v854_v12, 4 }
 0x60d   : > { %v851_v17 = vadd.f32 %v850_v14, %v849_v11  ;;  %v856_v19 = vadd.f32 %v855_v15, %v854_v12 }
 0x60f   : > { %v852_v20 = vrot.slane %v851_v17, 1  ;;  %v857_v23 = vrot.slane %v856_v19, 2 }
 0x611   : > { %v853_v28 = vadd.f32 %v852_v20, %v851_v17  ;;  %v858_v13 = vadd.f32 %v857_v23, %v856_v19 }
 0x613   : > { %v861_v31 = vadd.f32 %v853_v28, %v770_v8  ;;  %v859_v32 = vrot.slane %v858_v13, 1  ;;  %v698_v8 = vld [vmem:[%s2118_s11 + $0x2] sm:$0x3] }
 0x615   : > { %vm865_vm11 = vcmp.gt.f32.partialorder %v861_v31, 1.0  ;;  %vm871_vm5 = vcmp.gt.f32.partialorder %v861_v31, 0.0  ;;  %v860_v36 = vadd.f32 %v859_v32, %v858_v13 }
 0x616   : > { %vm867_vm6 = vmand %vm863_vm10, %vm865_vm11  ;;  %vm870_vm11 = vcmp.le.f32.partialorder %v777_v16, 0.0 }
 0x617   : > { %vm873_vm14 = vmand %vm869_vm12, %vm871_vm5  ;;  %v862_v38 = vadd.f32 %v860_v36, %v777_v16 }
 0x618   : > { %vm877_vm8 = vmand %vm875_vm13, %vm867_vm6 }
 0x619   : > { %vm881_vm15 = vmand %vm879_vm7, %vm873_vm14  ;;  %v883_v21 = vsel %vm877_vm8, %v2259_v43, %v795_v39  ;;  %vm866_vm1 = vcmp.gt.f32.partialorder %v862_v38, 1.0  ;;  %vm872_vm10 = vcmp.gt.f32.partialorder %v862_v38, 0.0 }
 0x61a   : > { %v885_v22 = vsel %vm881_vm15, %v2259_v43, %v797_v40  ;;  %vm868_vm5 = vmand %vm864_vm0, %vm866_vm1  ;;  %v894_v43 = vstv %s893_s16 }
 0x61b   : > { %v887_v25 = vsub.f32 %v885_v22, %v883_v21  ;;  %vm874_vm12 = vmand %vm870_vm11, %vm872_vm10 }
 0x61c   : > { %vm878_vm6 = vmand %vm876_vm2, %vm868_vm5 }
 0x61d   : > { %v889_v26 = vmul.f32 0.8725, %v887_v25  ;;  %vm882_vm13 = vmand %vm880_vm3, %vm874_vm12  ;;  %v884_v42 = vsel %vm878_vm6, %v2263_v50, %v796_v18 }
 0x61e   : > { %v886_v46 = vsel %vm882_vm13, %v2263_v50, %v798_v29 }
 0x61f   : > { %v891_v48 = vadd.f32 %v889_v26, %v883_v21  ;;  %v888_v51 = vsub.f32 %v886_v46, %v884_v42 }
 0x621   : > { %v895_v52 = vmul.f32 %v894_v43, %v891_v48  ;;  %v899_v53 = vmul.f32 %v898_v45, %v891_v48  ;;  %v890_v54 = vmul.f32 0.8725, %v888_v51 }
 0x623   : > { %v901_v55 = vmax.f32 %v899_v53, %v895_v52  ;;  %v892_v0 = vadd.f32 %v890_v54, %v884_v42 }
 0x625   : > { %1342 = vrcp.f32 %v901_v55  ;;  %v896_v56 = vmul.f32 %v894_v43, %v892_v0  ;;  %v900_v49 = vmul.f32 %v898_v45, %v892_v0 }
 0x627   : > { %v902_v1 = vmax.f32 %v900_v49, %v896_v56 }
 0x629   : > { %1344 = vrcp.f32 %v902_v1 }
 0x632   : > { %v1343_v57 = vpop.eup %1342 }
 0x633   : > { %v904_v58 = vmul.f32 %v1343_v57, %v895_v52 }
 0x635   : > { %v907_v50 = vmul.f32 %v904_v58, %v2232_v62 }
 0x636   : > { %v1345_v60 = vpop.eup %1344 }
 0x637   : > { %v909_v2 = vadd.f32 %v907_v50, %v2229_v59  ;;  %v906_v3 = vmul.f32 %v1345_v60, %v896_v56 }
 0x639   : > { %v912_v47 = vmul.f32 %v911_v61, %v909_v2  ;;  %v908_v6 = vmul.f32 %v906_v3, %v2239_v4 }
 0x63b   : > { %v914_v7 = vadd.f32 %v912_v47, %v697_v5  ;;  %v910_v44 = vadd.f32 %v908_v6, %v2234_v63 }
 0x63d   : > { %916 = vst [vmem:[%s2118_s11] sm:$0x3] %v914_v7  ;;  %v913_v10 = vmul.f32 %v911_v61, %v910_v44 }
 0x63f   : > { %v915_v11 = vadd.f32 %v913_v10, %v698_v8 }
 0x641   : > { %917 = vst [vmem:[%s2118_s11 + $0x2] sm:$0x3] %v915_v11 }
 0x642 PF: > { %s2499_s14 = sld [smem:[#allocation29_spill]]  ;;  %v918_v59 = vld [vmem:[%s2111_s6] sm:$0x3]  ;;  %v919_v62 = vld [vmem:[%s399_s28] sm:$0x3]  ;;  %s948_s12 = sshll.u32 %s2118_s11, 4  ;;  %s2320_s12 = int_to_ptr.vmem [resolvable:$true] %s948_s12 }
 0x643   : > { %s2500_s9 = sld [smem:[#allocation30_spill]]  ;;  %v921_v9 = vmul.f32 %v919_v62, %v918_v59  ;;  %v925_v63 = vsub.f32 1.0, %v918_v59  ;;  %v920_v12 = vld [vmem:[%s399_s28 + $0x2] sm:$0x3]  ;;  %s933_s5 = scalar_lea.sflag [#allocation9], %s2089_s29 }
 0x644   : > { %v923_v4 = vld [vmem:[%s2118_s11] sm:$0x3]  ;;  %v922_v15 = vmul.f32 %v920_v12, %v918_v59  ;;  %s2501_s27 = sld [smem:[#allocation43_spill]]  ;;  %s1502_s10 = scalar_lea.vmem %s2320_s12, 64 }
 0x645   : > { %v926_v16 = vmul.f32 %v925_v63, %v923_v4  ;;  %p1503_p12 = scmp.ne.s32.totalorder %s2320_s12, %s1502_s10  ;;  %p2503_p5 = scmp.ne.s32.totalorder %s2477_s21, 0 }
 0x646   : > { %s1674_s20 = smov [#allocation15]  }
 0x647   : > { %v928_v19 = vadd.f32 %v926_v16, %v921_v9  ;;  %p1504_p10 = pnand %p1503_p12, %p2503_p5  ;;  %s1506_s23 = sshll.u32 %s1674_s20, 4  ;;  %s1507_s23 = int_to_ptr.vmem [resolvable:$false] %s1506_s23 }
 0x648   : > { %v924_v14 = vld [vmem:[%s2118_s11 + $0x2] sm:$0x3]  ;;  %s1174_s18 = sshll.u32 %s2499_s14, 1  ;;  %s1508_s22 = scalar_lea.vmem %s1507_s23, 128 }
 0x649   : > { %s1175_s0 = sshll.u32 %s2500_s9, 2  ;;  %v927_v17 = vmul.f32 %v925_v63, %v924_v14  ;;  %930 = vst [vmem:[%s2118_s11] sm:$0x3] %v928_v19  ;;  %p1505_p1 = pneg %p1504_p10 }
 0x64a   : > { %s945_s17 = sadd.s32 %s1175_s0, %s1174_s18  ;;  %s2502_s1 = smov %s2501_s27 }
 0x64b   : > { %s1176_s6 = sshll.u32 %s945_s17, 5  ;;  %v929_v20 = vadd.f32 %v927_v17, %v922_v15  ;;  %p1509_p3 = scmp.lt.s32.totalorder %s2320_s12, %s1507_s23 }
 0x64c   : > { %s2325_s13 = scalar_lea.hbm %s2501_s27, %s1176_s6  ;;  %p1510_p6 = scmp.lt.s32.totalorder %s1508_s22, %s1502_s10 }
 0x64d   : > { %931 = vst [vmem:[%s2118_s11 + $0x2] sm:$0x3] %v929_v20 }
 0x64e   : > { %p1511_p2 = por %p1510_p6, %p1509_p3 }
 0x650   : > { %p1512_p7 = pnand %p1511_p2, %p1505_p1 }
 0x652   : > { %1515 = shalt.err (!%p1512_p7)
}
 0x653   : > { %s1516_s11 = scalar_lea.hbm %s2325_s13, 64  ;;  %s1520_s16 = scalar_lea.hbm %s2502_s1, 256 }
 0x654   : > { %p1517_p11 = scmp.ne.s32.totalorder %s2325_s13, %s1516_s11  ;;  %p1521_p0 = scmp.lt.s32.totalorder %s2325_s13, %s2502_s1 }
 0x655   : > { %p1522_p4 = scmp.lt.s32.totalorder %s1520_s16, %s1516_s11 }
 0x656   : > { %p1518_p9 = pnand %p1517_p11, %p2503_p5 }
 0x657   : > { %p1523_p12 = por %p1522_p4, %p1521_p0 }
 0x658   : > { %p1519_p13 = pneg %p1518_p9 }
 0x65a   : > { %p1524_p10 = pnand %p1523_p12, %p1519_p13 }
 0x65c   : > { %1527 = shalt.err (!%p1524_p10)
}
 0x65d   : > { %s1675_s9 = smov 32   ;;  %s1676_s18 = smov 2  }
 0x65e   : > { %1191 = dma.vmem_to_hbm [thread:$0]  (%p2503_p5), %s2320_s12, 64, %s2325_s13, %s933_s5, %s1675_s9, %s1675_s9, %s1676_s18  }
 0x65f PF: > { %p1215_p1 = scmp.ge.s32.totalorder %s1660_s15, 2  ;;  %s963_s0 = sand.u32 1, %s1608_s3  }
 0x660   : > { %s964_s17 = scalar_lea.sflag [#allocation9], %s963_s0 }
 0x661   : > { %p1211_p3 = pnand %p1215_p1, %p2024_p8 }
 0x663   : > { %p1212_p6 = pneg %p1211_p3 }
 0x665   : > { %1603 = dma.done.wait (%p1212_p6), %s964_s17, 64  }
 0x666   : > { %1605 = vsyncadd (%p1212_p6), %s964_s17, 4294967232  ;;  %s47_s15 = sadd.s32 1, %s1660_s15   ;;  %s2505_s26 = sld [smem:[#allocation26_spill]] }
 0x667   : > { %p2357_p2 = scmp.ge.s32.totalorder %s47_s15, 6   ;;  %s2506_s27 = sld [smem:[#allocation27_spill]] }
 0x668   : > { %s2507_s28 = sld [smem:[#allocation36_spill]]  ;;  %s2514_s3 = smov %s1612_s24 }
 0x669   : > { %s2508_s21 = sld [smem:[#allocation28_spill]]  ;;  %s2515_s24 = smov %s1616_s25 }
 0x66a   : > { %s2509_s10 = sld [smem:[#allocation37_spill]]  ;;  %s2516_s25 = smov %s1957_s2 }
 0x66b   : > { %s2510_s11 = sld [smem:[#allocation31_spill]]  ;;  %s2517_s29 = smov %s1636_s30 }
 0x66c   : > { %s2511_s12 = sld [smem:[#allocation32_spill]]  ;;  %46 = sbr.rel (!%p2357_p2) target bundleno = 52 (0x34), region = 133 }
 0x66d   : > { %s2512_s13 = sld [smem:[#allocation33_spill]] }
 0x66e   : > { %s2513_s14 = sld [smem:[#allocation34_spill]] }
 0x66f   : > { %s2518_s30 = smov %s2508_s21 }
 0x671   :  { %969 = vsyncpa [#allocation8], 1 }
 0x672   :  { %971 = vsyncpa [#allocation8 + $0x1], 1 }
 0x673   :  { %972 = vsyncpa [#allocation11], 1 }
 0x674   :  { %974 = vsyncpa [#allocation11 + $0x1], 1 }
 0x675   :  { %975 = vsyncpa [#allocation14], 1 }
 0x676   :  { %977 = vsyncpa [#allocation14 + $0x1], 1 }
 0x677   :  { %978 = vsyncpa [#allocation9], 1 }
 0x678   :  { %980 = vsyncpa [#allocation9 + $0x1], 1 }

</bundles_post_ra>
